<compile_context>
chip_gen: v7x
topology: tpu7x:2x2x1
jax: 0.10.0
libtpu: 0.0.40
codegen_flags: <defaults>
</compile_context>

<pallas_src>
import functools

import jax
import jax.numpy as jnp
from jax import lax
from jax.experimental import pallas as pl
from jax.experimental.pallas import tpu as pltpu


def make_lstm_kernel(hidden_dim: int, seq_len: int, batch_pad: int):
    H = hidden_dim
    T = seq_len
    Bp = batch_pad            # padded batch (multiple of 8)
    H4 = 4 * H

    def kernel(emb_ref,        # (T*Bp, E)  f32   time-major, batch padded, flattened
               wih_cat_ref,    # (E, 8H)          [wih_fwd | wih_bwd] along lanes
               b_cat_ref,      # (1, 8H)          [b_fwd | b_bwd]   (= b_ih + b_hh)
               whh_f_ref,      # (H, 4H)
               whh_b_ref,      # (H, 4H)
               wfc_f_ref,      # (H, O)           fc weight, forward half
               wfc_b_ref,      # (H, O)           fc weight, backward half
               bfc_ref,        # (1, O)
               out_ref,        # (Bp, O)
               g_ref):         # VMEM scratch (T*Bp, 8H) f32 — precomputed input gates

        # ---- hoisted input projection: one well-shaped MXU matmul, off the serial chain
        g_ref[...] = (jnp.dot(emb_ref[...], wih_cat_ref[...],
                              preferred_element_type=jnp.float32)
                      + b_cat_ref[...])

        def act(gates):
            # full-vreg transcendentals on (Bp, 4H), cheap lane slices afterwards
            s = jax.nn.sigmoid(gates)
            th = jnp.tanh(gates)
            i_g = s[:, 0 * H:1 * H]
            f_g = s[:, 1 * H:2 * H]
            g_g = th[:, 2 * H:3 * H]
            o_g = s[:, 3 * H:4 * H]
            return i_g, f_g, g_g, o_g

        # ---- fused forward + backward recurrence (independent chains interleave)
        def step(t, carry):
            h_f, c_f, h_b, c_b = carry
            rf = pl.multiple_of(t * Bp, Bp)                # 8-aligned sublane offsets
            rb = pl.multiple_of((T - 1 - t) * Bp, Bp)
            gates_f = (g_ref[pl.ds(rf, Bp), 0:H4]
                       + jnp.dot(h_f, whh_f_ref[...],
                                 preferred_element_type=jnp.float32))
            gates_b = (g_ref[pl.ds(rb, Bp), H4:2 * H4]
                       + jnp.dot(h_b, whh_b_ref[...],
                                 preferred_element_type=jnp.float32))
            i_f, f_f, g_f, o_f = act(gates_f)
            i_b, f_b, g_b, o_b = act(gates_b)
            c_f_new = f_f * c_f + i_f * g_f
            c_b_new = f_b * c_b + i_b * g_b
            h_f_new = o_f * jnp.tanh(c_f_new)
            h_b_new = o_b * jnp.tanh(c_b_new)
            return (h_f_new, c_f_new, h_b_new, c_b_new)

        zeros = jnp.zeros((Bp, H), jnp.float32)
        h_f, _, h_b, _ = lax.fori_loop(0, T, step, (zeros, zeros, zeros, zeros),
                                       unroll=True)   # T is static; unroll for LLO visibility

        # ---- head: no lane concat — two accumulating matmuls against pre-split fc weight
        out_ref[...] = (jnp.dot(h_f, wfc_f_ref[...], preferred_element_type=jnp.float32)
                        + jnp.dot(h_b, wfc_b_ref[...], preferred_element_type=jnp.float32)
                        + bfc_ref[...])

    return kernel


class LSTMPallas:
    """Bidirectional single-layer LSTM classifier (dropout p=0 -> identity)."""

    def __init__(self, vocab_size, embedding_dim, hidden_dim, output_dim, key):
        self.vocab_size = vocab_size
        self.embedding_dim = embedding_dim
        self.hidden_dim = hidden_dim
        self.output_dim = output_dim

        ks = jax.random.split(key, 10)
        H, E, O = hidden_dim, embedding_dim, output_dim
        bound = 1.0 / jnp.sqrt(jnp.float32(H))

        def u(k, shape, b):
            return jax.random.uniform(k, shape, jnp.float32, -b, b)

        # Embedding table (PyTorch: N(0,1))
        self.embedding = jax.random.normal(ks[0], (vocab_size, E), jnp.float32)

        # LSTM params, stored pre-transposed: (in_features, 4H); gate order i,f,g,o.
        self.wih_f = u(ks[1], (E, 4 * H), bound)
        self.whh_f = u(ks[2], (H, 4 * H), bound)
        self.b_f = u(ks[3], (1, 4 * H), bound) + u(ks[4], (1, 4 * H), bound)   # b_ih + b_hh
        self.wih_b = u(ks[5], (E, 4 * H), bound)
        self.whh_b = u(ks[6], (H, 4 * H), bound)
        self.b_b = u(ks[7], (1, 4 * H), bound) + u(ks[8], (1, 4 * H), bound)

        # fc: Linear(2H, O), pre-transposed to (2H, O)
        fc_bound = 1.0 / jnp.sqrt(jnp.float32(2 * H))
        kfc_w, kfc_b = jax.random.split(ks[9])
        self.wfc = u(kfc_w, (2 * H, O), fc_bound)
        self.bfc = u(kfc_b, (1, O), fc_bound)

        # Kernel-friendly derived parameters.
        self.wih_cat = jnp.concatenate([self.wih_f, self.wih_b], axis=1)   # (E, 8H)
        self.b_cat = jnp.concatenate([self.b_f, self.b_b], axis=1)         # (1, 8H)
        self.wfc_f = self.wfc[:H, :]                                       # (H, O)
        self.wfc_b = self.wfc[H:, :]                                       # (H, O)

    @functools.partial(jax.jit, static_argnums=0)
    def __call__(self, x, valid_lens):
        # x: (batch, seq) int32 token ids. valid_lens is unused (matches the PyTorch forward).
        # TODO(synk): valid_lens is ignored — padding tokens feed the backward direction,
        # matching the reference module (not a length-aware packed LSTM).
        del valid_lens
        batch, seq = x.shape
        H, E, O = self.hidden_dim, self.embedding_dim, self.output_dim

        # Pad batch to a multiple of 8 (f32 sublane count): full vregs / MXU rows,
        # and 8-aligned dynamic sublane slices inside the kernel.
        Bp = max(8, ((batch + 7) // 8) * 8)
        x_p = jnp.pad(x, ((0, Bp - batch), (0, 0)))          # pad rows with token 0
        x_t = jnp.transpose(x_p, (1, 0))                     # (seq, Bp)  == x.permute(1, 0)
        emb = jnp.take(self.embedding, x_t, axis=0)          # (seq, Bp, E) — gather glue in JAX
        emb2d = emb.reshape(seq * Bp, E)                     # time-major, flattened for one matmul

        kernel = make_lstm_kernel(H, seq, Bp)
        out = pl.pallas_call(
            kernel,
            out_shape=jax.ShapeDtypeStruct((Bp, O), jnp.float32),
            in_specs=[pl.BlockSpec(memory_space=pltpu.MemorySpace.VMEM)] * 8,
            out_specs=pl.BlockSpec(memory_space=pltpu.MemorySpace.VMEM),
            scratch_shapes=[pltpu.VMEM((seq * Bp, 8 * H), jnp.float32)],
            compiler_params=pltpu.CompilerParams(vmem_limit_bytes=32 * 1024 * 1024),
        )(emb2d, self.wih_cat, self.b_cat, self.whh_f, self.whh_b,
          self.wfc_f, self.wfc_b, self.bfc)
        return out[:batch]


def _reference_forward(model: LSTMPallas, x):
    """Pure-JAX reference for correctness checking (unpadded, per-direction loops)."""
    H = model.hidden_dim
    x_t = jnp.transpose(x, (1, 0))
    emb = jnp.take(model.embedding, x_t, axis=0)             # (T, B, E)
    T, B, _ = emb.shape

    def run(wih, whh, b, order):
        h = jnp.zeros((B, H), jnp.float32)
        c = jnp.zeros((B, H), jnp.float32)
        for t in order:
            gates = emb[t] @ wih + h @ whh + b
            i = jax.nn.sigmoid(gates[:, :H])
            f = jax.nn.sigmoid(gates[:, H:2 * H])
            g = jnp.tanh(gates[:, 2 * H:3 * H])
            o = jax.nn.sigmoid(gates[:, 3 * H:])
            c = f * c + i * g
            h = o * jnp.tanh(c)
        return h

    h_f = run(model.wih_f, model.whh_f, model.b_f, range(T))
    h_b = run(model.wih_b, model.whh_b, model.b_b, range(T - 1, -1, -1))
    hid = jnp.concatenate([h_f, h_b], axis=1)
    return hid @ model.wfc + model.bfc


if __name__ == "__main__":
    key = jax.random.PRNGKey(0)
    k_param, k_x, k_len = jax.random.split(key, 3)

    vocab_size, embedding_dim, hidden_dim, output_dim = 50, 16, 32, 4
    batch, seq = 2, 8

    model = LSTMPallas(vocab_size, embedding_dim, hidden_dim, output_dim, k_param)

    x = jax.random.randint(k_x, (batch, seq), 0, vocab_size, dtype=jnp.int32)
    valid_lens = jnp.full((batch,), seq, dtype=jnp.int32)

    out = model(x, valid_lens)
    out = jax.block_until_ready(out)

    ref = _reference_forward(model, x)
    assert out.shape == (batch, output_dim), out.shape
    assert jnp.allclose(out, ref, atol=1e-4, rtol=1e-4), (out, ref)

    print("KERNEL_OK")
</pallas_src>

<mosaic_0001>
module attributes {stable_mosaic.version = 11 : i64} {
  func.func @kernel(%arg0: memref<64x16xf32, #tpu.memory_space<vmem>>, %arg1: memref<16x256xf32, #tpu.memory_space<vmem>>, %arg2: memref<1x256xf32, #tpu.memory_space<vmem>>, %arg3: memref<32x128xf32, #tpu.memory_space<vmem>>, %arg4: memref<32x128xf32, #tpu.memory_space<vmem>>, %arg5: memref<32x4xf32, #tpu.memory_space<vmem>>, %arg6: memref<32x4xf32, #tpu.memory_space<vmem>>, %arg7: memref<1x4xf32, #tpu.memory_space<vmem>>, %arg8: memref<8x4xf32, #tpu.memory_space<vmem>>, %arg9: memref<64x256xf32, #tpu.memory_space<vmem>>) attributes {dimension_semantics = [], scalar_prefetch = 0 : i64, scratch_operands = 1 : i64, tpu.core_type = #tpu.core_type<tc>} {
    %c0 = arith.constant 0 : index
    %c0_0 = arith.constant 0 : index
    %0 = vector.load %arg0[%c0, %c0_0] : memref<64x16xf32, #tpu.memory_space<vmem>>, vector<64x16xf32>
    %c0_1 = arith.constant 0 : index
    %c0_2 = arith.constant 0 : index
    %1 = vector.load %arg1[%c0_1, %c0_2] : memref<16x256xf32, #tpu.memory_space<vmem>>, vector<16x256xf32>
    %cst = arith.constant dense<0.000000e+00> : vector<64x256xf32>
    %2 = tpu.matmul %0, %1, %cst {dimension_numbers = #tpu.dot_dimension_numbers<[1], [0], [0], [1], [0, 0, 1, 1], [], []>} : vector<64x16xf32>, vector<16x256xf32>, vector<64x256xf32> -> vector<64x256xf32>
    %c0_3 = arith.constant 0 : index
    %c0_4 = arith.constant 0 : index
    %3 = vector.load %arg2[%c0_3, %c0_4] : memref<1x256xf32, #tpu.memory_space<vmem>>, vector<1x256xf32>
    %4 = vector.broadcast %3 : vector<1x256xf32> to vector<64x256xf32>
    %5 = arith.addf %2, %4 : vector<64x256xf32>
    %c0_5 = arith.constant 0 : index
    %c0_6 = arith.constant 0 : index
    %6 = vector.load %arg9[%c0_5, %c0_6] : memref<64x256xf32, #tpu.memory_space<vmem>>, vector<64x256xf32>
    tpu.vector_store %arg9[%c0_5, %c0_6], %5 {strides = array<i32>} : memref<64x256xf32, #tpu.memory_space<vmem>>, vector<64x256xf32>,
    %cst_7 = arith.constant 0.000000e+00 : f32
    %7 = vector.broadcast %cst_7 : f32 to vector<8x32xf32>
    %c0_i32 = arith.constant 0 : i32
    %c8_i32 = arith.constant 8 : i32
    %8 = arith.muli %c0_i32, %c8_i32 : i32
    %9 = tpu.assume_multiple %8, 8 : i32
    %c7_i32 = arith.constant 7 : i32
    %10 = arith.subi %c7_i32, %c0_i32 : i32
    %c8_i32_8 = arith.constant 8 : i32
    %11 = arith.muli %10, %c8_i32_8 : i32
    %12 = tpu.assume_multiple %11, 8 : i32
    %13 = arith.index_cast %9 : i32 to index
    %c0_9 = arith.constant 0 : index
    %14 = vector.load %arg9[%13, %c0_9] : memref<64x256xf32, #tpu.memory_space<vmem>>, vector<8x128xf32>
    %c0_10 = arith.constant 0 : index
    %c0_11 = arith.constant 0 : index
    %15 = vector.load %arg3[%c0_10, %c0_11] : memref<32x128xf32, #tpu.memory_space<vmem>>, vector<32x128xf32>
    %cst_12 = arith.constant dense<0.000000e+00> : vector<8x128xf32>
    %16 = tpu.matmul %7, %15, %cst_12 {dimension_numbers = #tpu.dot_dimension_numbers<[1], [0], [0], [1], [0, 0, 1, 1], [], []>} : vector<8x32xf32>, vector<32x128xf32>, vector<8x128xf32> -> vector<8x128xf32>
    %17 = arith.addf %14, %16 : vector<8x128xf32>
    %18 = arith.index_cast %12 : i32 to index
    %c128 = arith.constant 128 : index
    %19 = vector.load %arg9[%18, %c128] : memref<64x256xf32, #tpu.memory_space<vmem>>, vector<8x128xf32>
    %c0_13 = arith.constant 0 : index
    %c0_14 = arith.constant 0 : index
    %20 = vector.load %arg4[%c0_13, %c0_14] : memref<32x128xf32, #tpu.memory_space<vmem>>, vector<32x128xf32>
    %cst_15 = arith.constant dense<0.000000e+00> : vector<8x128xf32>
    %21 = tpu.matmul %7, %20, %cst_15 {dimension_numbers = #tpu.dot_dimension_numbers<[1], [0], [0], [1], [0, 0, 1, 1], [], []>} : vector<8x32xf32>, vector<32x128xf32>, vector<8x128xf32> -> vector<8x128xf32>
    %22 = arith.addf %19, %21 : vector<8x128xf32>
    %23 = arith.negf %17 : vector<8x128xf32>
    %24 = math.exp %23 : vector<8x128xf32>
    %cst_16 = arith.constant 1.000000e+00 : f32
    %25 = vector.broadcast %cst_16 : f32 to vector<8x128xf32>
    %26 = arith.addf %25, %24 : vector<8x128xf32>
    %27 = arith.divf %25, %26 : vector<8x128xf32>
    %28 = math.tanh %17 : vector<8x128xf32>
    %29 = vector.extract_strided_slice %27 {offsets = [0, 0], sizes = [8, 32], strides = [1, 1]} : vector<8x128xf32> to vector<8x32xf32>
    %30 = vector.extract_strided_slice %27 {offsets = [0, 32], sizes = [8, 32], strides = [1, 1]} : vector<8x128xf32> to vector<8x32xf32>
    %31 = vector.extract_strided_slice %28 {offsets = [0, 64], sizes = [8, 32], strides = [1, 1]} : vector<8x128xf32> to vector<8x32xf32>
    %32 = vector.extract_strided_slice %27 {offsets = [0, 96], sizes = [8, 32], strides = [1, 1]} : vector<8x128xf32> to vector<8x32xf32>
    %33 = arith.negf %22 : vector<8x128xf32>
    %34 = math.exp %33 : vector<8x128xf32>
    %cst_17 = arith.constant 1.000000e+00 : f32
    %35 = vector.broadcast %cst_17 : f32 to vector<8x128xf32>
    %36 = arith.addf %35, %34 : vector<8x128xf32>
    %37 = arith.divf %35, %36 : vector<8x128xf32>
    %38 = math.tanh %22 : vector<8x128xf32>
    %39 = vector.extract_strided_slice %37 {offsets = [0, 0], sizes = [8, 32], strides = [1, 1]} : vector<8x128xf32> to vector<8x32xf32>
    %40 = vector.extract_strided_slice %37 {offsets = [0, 32], sizes = [8, 32], strides = [1, 1]} : vector<8x128xf32> to vector<8x32xf32>
    %41 = vector.extract_strided_slice %38 {offsets = [0, 64], sizes = [8, 32], strides = [1, 1]} : vector<8x128xf32> to vector<8x32xf32>
    %42 = vector.extract_strided_slice %37 {offsets = [0, 96], sizes = [8, 32], strides = [1, 1]} : vector<8x128xf32> to vector<8x32xf32>
    %43 = arith.mulf %30, %7 : vector<8x32xf32>
    %44 = arith.mulf %29, %31 : vector<8x32xf32>
    %45 = arith.addf %43, %44 : vector<8x32xf32>
    %46 = arith.mulf %40, %7 : vector<8x32xf32>
    %47 = arith.mulf %39, %41 : vector<8x32xf32>
    %48 = arith.addf %46, %47 : vector<8x32xf32>
    %49 = math.tanh %45 : vector<8x32xf32>
    %50 = arith.mulf %32, %49 : vector<8x32xf32>
    %51 = math.tanh %48 : vector<8x32xf32>
    %52 = arith.mulf %42, %51 : vector<8x32xf32>
    %c1_i32 = arith.constant 1 : i32
    %c8_i32_18 = arith.constant 8 : i32
    %53 = arith.muli %c1_i32, %c8_i32_18 : i32
    %54 = tpu.assume_multiple %53, 8 : i32
    %c7_i32_19 = arith.constant 7 : i32
    %55 = arith.subi %c7_i32_19, %c1_i32 : i32
    %c8_i32_20 = arith.constant 8 : i32
    %56 = arith.muli %55, %c8_i32_20 : i32
    %57 = tpu.assume_multiple %56, 8 : i32
    %58 = arith.index_cast %54 : i32 to index
    %c0_21 = arith.constant 0 : index
    %59 = vector.load %arg9[%58, %c0_21] : memref<64x256xf32, #tpu.memory_space<vmem>>, vector<8x128xf32>
    %c0_22 = arith.constant 0 : index
    %c0_23 = arith.constant 0 : index
    %60 = vector.load %arg3[%c0_22, %c0_23] : memref<32x128xf32, #tpu.memory_space<vmem>>, vector<32x128xf32>
    %cst_24 = arith.constant dense<0.000000e+00> : vector<8x128xf32>
    %61 = tpu.matmul %50, %60, %cst_24 {dimension_numbers = #tpu.dot_dimension_numbers<[1], [0], [0], [1], [0, 0, 1, 1], [], []>} : vector<8x32xf32>, vector<32x128xf32>, vector<8x128xf32> -> vector<8x128xf32>
    %62 = arith.addf %59, %61 : vector<8x128xf32>
    %63 = arith.index_cast %57 : i32 to index
    %c128_25 = arith.constant 128 : index
    %64 = vector.load %arg9[%63, %c128_25] : memref<64x256xf32, #tpu.memory_space<vmem>>, vector<8x128xf32>
    %c0_26 = arith.constant 0 : index
    %c0_27 = arith.constant 0 : index
    %65 = vector.load %arg4[%c0_26, %c0_27] : memref<32x128xf32, #tpu.memory_space<vmem>>, vector<32x128xf32>
    %cst_28 = arith.constant dense<0.000000e+00> : vector<8x128xf32>
    %66 = tpu.matmul %52, %65, %cst_28 {dimension_numbers = #tpu.dot_dimension_numbers<[1], [0], [0], [1], [0, 0, 1, 1], [], []>} : vector<8x32xf32>, vector<32x128xf32>, vector<8x128xf32> -> vector<8x128xf32>
    %67 = arith.addf %64, %66 : vector<8x128xf32>
    %68 = arith.negf %62 : vector<8x128xf32>
    %69 = math.exp %68 : vector<8x128xf32>
    %cst_29 = arith.constant 1.000000e+00 : f32
    %70 = vector.broadcast %cst_29 : f32 to vector<8x128xf32>
    %71 = arith.addf %70, %69 : vector<8x128xf32>
    %72 = arith.divf %70, %71 : vector<8x128xf32>
    %73 = math.tanh %62 : vector<8x128xf32>
    %74 = vector.extract_strided_slice %72 {offsets = [0, 0], sizes = [8, 32], strides = [1, 1]} : vector<8x128xf32> to vector<8x32xf32>
    %75 = vector.extract_strided_slice %72 {offsets = [0, 32], sizes = [8, 32], strides = [1, 1]} : vector<8x128xf32> to vector<8x32xf32>
    %76 = vector.extract_strided_slice %73 {offsets = [0, 64], sizes = [8, 32], strides = [1, 1]} : vector<8x128xf32> to vector<8x32xf32>
    %77 = vector.extract_strided_slice %72 {offsets = [0, 96], sizes = [8, 32], strides = [1, 1]} : vector<8x128xf32> to vector<8x32xf32>
    %78 = arith.negf %67 : vector<8x128xf32>
    %79 = math.exp %78 : vector<8x128xf32>
    %cst_30 = arith.constant 1.000000e+00 : f32
    %80 = vector.broadcast %cst_30 : f32 to vector<8x128xf32>
    %81 = arith.addf %80, %79 : vector<8x128xf32>
    %82 = arith.divf %80, %81 : vector<8x128xf32>
    %83 = math.tanh %67 : vector<8x128xf32>
    %84 = vector.extract_strided_slice %82 {offsets = [0, 0], sizes = [8, 32], strides = [1, 1]} : vector<8x128xf32> to vector<8x32xf32>
    %85 = vector.extract_strided_slice %82 {offsets = [0, 32], sizes = [8, 32], strides = [1, 1]} : vector<8x128xf32> to vector<8x32xf32>
    %86 = vector.extract_strided_slice %83 {offsets = [0, 64], sizes = [8, 32], strides = [1, 1]} : vector<8x128xf32> to vector<8x32xf32>
    %87 = vector.extract_strided_slice %82 {offsets = [0, 96], sizes = [8, 32], strides = [1, 1]} : vector<8x128xf32> to vector<8x32xf32>
    %88 = arith.mulf %75, %45 : vector<8x32xf32>
    %89 = arith.mulf %74, %76 : vector<8x32xf32>
    %90 = arith.addf %88, %89 : vector<8x32xf32>
    %91 = arith.mulf %85, %48 : vector<8x32xf32>
    %92 = arith.mulf %84, %86 : vector<8x32xf32>
    %93 = arith.addf %91, %92 : vector<8x32xf32>
    %94 = math.tanh %90 : vector<8x32xf32>
    %95 = arith.mulf %77, %94 : vector<8x32xf32>
    %96 = math.tanh %93 : vector<8x32xf32>
    %97 = arith.mulf %87, %96 : vector<8x32xf32>
    %c2_i32 = arith.constant 2 : i32
    %c8_i32_31 = arith.constant 8 : i32
    %98 = arith.muli %c2_i32, %c8_i32_31 : i32
    %99 = tpu.assume_multiple %98, 8 : i32
    %c7_i32_32 = arith.constant 7 : i32
    %100 = arith.subi %c7_i32_32, %c2_i32 : i32
    %c8_i32_33 = arith.constant 8 : i32
    %101 = arith.muli %100, %c8_i32_33 : i32
    %102 = tpu.assume_multiple %101, 8 : i32
    %103 = arith.index_cast %99 : i32 to index
    %c0_34 = arith.constant 0 : index
    %104 = vector.load %arg9[%103, %c0_34] : memref<64x256xf32, #tpu.memory_space<vmem>>, vector<8x128xf32>
    %c0_35 = arith.constant 0 : index
    %c0_36 = arith.constant 0 : index
    %105 = vector.load %arg3[%c0_35, %c0_36] : memref<32x128xf32, #tpu.memory_space<vmem>>, vector<32x128xf32>
    %cst_37 = arith.constant dense<0.000000e+00> : vector<8x128xf32>
    %106 = tpu.matmul %95, %105, %cst_37 {dimension_numbers = #tpu.dot_dimension_numbers<[1], [0], [0], [1], [0, 0, 1, 1], [], []>} : vector<8x32xf32>, vector<32x128xf32>, vector<8x128xf32> -> vector<8x128xf32>
    %107 = arith.addf %104, %106 : vector<8x128xf32>
    %108 = arith.index_cast %102 : i32 to index
    %c128_38 = arith.constant 128 : index
    %109 = vector.load %arg9[%108, %c128_38] : memref<64x256xf32, #tpu.memory_space<vmem>>, vector<8x128xf32>
    %c0_39 = arith.constant 0 : index
    %c0_40 = arith.constant 0 : index
    %110 = vector.load %arg4[%c0_39, %c0_40] : memref<32x128xf32, #tpu.memory_space<vmem>>, vector<32x128xf32>
    %cst_41 = arith.constant dense<0.000000e+00> : vector<8x128xf32>
    %111 = tpu.matmul %97, %110, %cst_41 {dimension_numbers = #tpu.dot_dimension_numbers<[1], [0], [0], [1], [0, 0, 1, 1], [], []>} : vector<8x32xf32>, vector<32x128xf32>, vector<8x128xf32> -> vector<8x128xf32>
    %112 = arith.addf %109, %111 : vector<8x128xf32>
    %113 = arith.negf %107 : vector<8x128xf32>
    %114 = math.exp %113 : vector<8x128xf32>
    %cst_42 = arith.constant 1.000000e+00 : f32
    %115 = vector.broadcast %cst_42 : f32 to vector<8x128xf32>
    %116 = arith.addf %115, %114 : vector<8x128xf32>
    %117 = arith.divf %115, %116 : vector<8x128xf32>
    %118 = math.tanh %107 : vector<8x128xf32>
    %119 = vector.extract_strided_slice %117 {offsets = [0, 0], sizes = [8, 32], strides = [1, 1]} : vector<8x128xf32> to vector<8x32xf32>
    %120 = vector.extract_strided_slice %117 {offsets = [0, 32], sizes = [8, 32], strides = [1, 1]} : vector<8x128xf32> to vector<8x32xf32>
    %121 = vector.extract_strided_slice %118 {offsets = [0, 64], sizes = [8, 32], strides = [1, 1]} : vector<8x128xf32> to vector<8x32xf32>
    %122 = vector.extract_strided_slice %117 {offsets = [0, 96], sizes = [8, 32], strides = [1, 1]} : vector<8x128xf32> to vector<8x32xf32>
    %123 = arith.negf %112 : vector<8x128xf32>
    %124 = math.exp %123 : vector<8x128xf32>
    %cst_43 = arith.constant 1.000000e+00 : f32
    %125 = vector.broadcast %cst_43 : f32 to vector<8x128xf32>
    %126 = arith.addf %125, %124 : vector<8x128xf32>
    %127 = arith.divf %125, %126 : vector<8x128xf32>
    %128 = math.tanh %112 : vector<8x128xf32>
    %129 = vector.extract_strided_slice %127 {offsets = [0, 0], sizes = [8, 32], strides = [1, 1]} : vector<8x128xf32> to vector<8x32xf32>
    %130 = vector.extract_strided_slice %127 {offsets = [0, 32], sizes = [8, 32], strides = [1, 1]} : vector<8x128xf32> to vector<8x32xf32>
    %131 = vector.extract_strided_slice %128 {offsets = [0, 64], sizes = [8, 32], strides = [1, 1]} : vector<8x128xf32> to vector<8x32xf32>
    %132 = vector.extract_strided_slice %127 {offsets = [0, 96], sizes = [8, 32], strides = [1, 1]} : vector<8x128xf32> to vector<8x32xf32>
    %133 = arith.mulf %120, %90 : vector<8x32xf32>
    %134 = arith.mulf %119, %121 : vector<8x32xf32>
    %135 = arith.addf %133, %134 : vector<8x32xf32>
    %136 = arith.mulf %130, %93 : vector<8x32xf32>
    %137 = arith.mulf %129, %131 : vector<8x32xf32>
    %138 = arith.addf %136, %137 : vector<8x32xf32>
    %139 = math.tanh %135 : vector<8x32xf32>
    %140 = arith.mulf %122, %139 : vector<8x32xf32>
    %141 = math.tanh %138 : vector<8x32xf32>
    %142 = arith.mulf %132, %141 : vector<8x32xf32>
    %c3_i32 = arith.constant 3 : i32
    %c8_i32_44 = arith.constant 8 : i32
    %143 = arith.muli %c3_i32, %c8_i32_44 : i32
    %144 = tpu.assume_multiple %143, 8 : i32
    %c7_i32_45 = arith.constant 7 : i32
    %145 = arith.subi %c7_i32_45, %c3_i32 : i32
    %c8_i32_46 = arith.constant 8 : i32
    %146 = arith.muli %145, %c8_i32_46 : i32
    %147 = tpu.assume_multiple %146, 8 : i32
    %148 = arith.index_cast %144 : i32 to index
    %c0_47 = arith.constant 0 : index
    %149 = vector.load %arg9[%148, %c0_47] : memref<64x256xf32, #tpu.memory_space<vmem>>, vector<8x128xf32>
    %c0_48 = arith.constant 0 : index
    %c0_49 = arith.constant 0 : index
    %150 = vector.load %arg3[%c0_48, %c0_49] : memref<32x128xf32, #tpu.memory_space<vmem>>, vector<32x128xf32>
    %cst_50 = arith.constant dense<0.000000e+00> : vector<8x128xf32>
    %151 = tpu.matmul %140, %150, %cst_50 {dimension_numbers = #tpu.dot_dimension_numbers<[1], [0], [0], [1], [0, 0, 1, 1], [], []>} : vector<8x32xf32>, vector<32x128xf32>, vector<8x128xf32> -> vector<8x128xf32>
    %152 = arith.addf %149, %151 : vector<8x128xf32>
    %153 = arith.index_cast %147 : i32 to index
    %c128_51 = arith.constant 128 : index
    %154 = vector.load %arg9[%153, %c128_51] : memref<64x256xf32, #tpu.memory_space<vmem>>, vector<8x128xf32>
    %c0_52 = arith.constant 0 : index
    %c0_53 = arith.constant 0 : index
    %155 = vector.load %arg4[%c0_52, %c0_53] : memref<32x128xf32, #tpu.memory_space<vmem>>, vector<32x128xf32>
    %cst_54 = arith.constant dense<0.000000e+00> : vector<8x128xf32>
    %156 = tpu.matmul %142, %155, %cst_54 {dimension_numbers = #tpu.dot_dimension_numbers<[1], [0], [0], [1], [0, 0, 1, 1], [], []>} : vector<8x32xf32>, vector<32x128xf32>, vector<8x128xf32> -> vector<8x128xf32>
    %157 = arith.addf %154, %156 : vector<8x128xf32>
    %158 = arith.negf %152 : vector<8x128xf32>
    %159 = math.exp %158 : vector<8x128xf32>
    %cst_55 = arith.constant 1.000000e+00 : f32
    %160 = vector.broadcast %cst_55 : f32 to vector<8x128xf32>
    %161 = arith.addf %160, %159 : vector<8x128xf32>
    %162 = arith.divf %160, %161 : vector<8x128xf32>
    %163 = math.tanh %152 : vector<8x128xf32>
    %164 = vector.extract_strided_slice %162 {offsets = [0, 0], sizes = [8, 32], strides = [1, 1]} : vector<8x128xf32> to vector<8x32xf32>
    %165 = vector.extract_strided_slice %162 {offsets = [0, 32], sizes = [8, 32], strides = [1, 1]} : vector<8x128xf32> to vector<8x32xf32>
    %166 = vector.extract_strided_slice %163 {offsets = [0, 64], sizes = [8, 32], strides = [1, 1]} : vector<8x128xf32> to vector<8x32xf32>
    %167 = vector.extract_strided_slice %162 {offsets = [0, 96], sizes = [8, 32], strides = [1, 1]} : vector<8x128xf32> to vector<8x32xf32>
    %168 = arith.negf %157 : vector<8x128xf32>
    %169 = math.exp %168 : vector<8x128xf32>
    %cst_56 = arith.constant 1.000000e+00 : f32
    %170 = vector.broadcast %cst_56 : f32 to vector<8x128xf32>
    %171 = arith.addf %170, %169 : vector<8x128xf32>
    %172 = arith.divf %170, %171 : vector<8x128xf32>
    %173 = math.tanh %157 : vector<8x128xf32>
    %174 = vector.extract_strided_slice %172 {offsets = [0, 0], sizes = [8, 32], strides = [1, 1]} : vector<8x128xf32> to vector<8x32xf32>
    %175 = vector.extract_strided_slice %172 {offsets = [0, 32], sizes = [8, 32], strides = [1, 1]} : vector<8x128xf32> to vector<8x32xf32>
    %176 = vector.extract_strided_slice %173 {offsets = [0, 64], sizes = [8, 32], strides = [1, 1]} : vector<8x128xf32> to vector<8x32xf32>
    %177 = vector.extract_strided_slice %172 {offsets = [0, 96], sizes = [8, 32], strides = [1, 1]} : vector<8x128xf32> to vector<8x32xf32>
    %178 = arith.mulf %165, %135 : vector<8x32xf32>
    %179 = arith.mulf %164, %166 : vector<8x32xf32>
    %180 = arith.addf %178, %179 : vector<8x32xf32>
    %181 = arith.mulf %175, %138 : vector<8x32xf32>
    %182 = arith.mulf %174, %176 : vector<8x32xf32>
    %183 = arith.addf %181, %182 : vector<8x32xf32>
    %184 = math.tanh %180 : vector<8x32xf32>
    %185 = arith.mulf %167, %184 : vector<8x32xf32>
    %186 = math.tanh %183 : vector<8x32xf32>
    %187 = arith.mulf %177, %186 : vector<8x32xf32>
    %c4_i32 = arith.constant 4 : i32
    %c8_i32_57 = arith.constant 8 : i32
    %188 = arith.muli %c4_i32, %c8_i32_57 : i32
    %189 = tpu.assume_multiple %188, 8 : i32
    %c7_i32_58 = arith.constant 7 : i32
    %190 = arith.subi %c7_i32_58, %c4_i32 : i32
    %c8_i32_59 = arith.constant 8 : i32
    %191 = arith.muli %190, %c8_i32_59 : i32
    %192 = tpu.assume_multiple %191, 8 : i32
    %193 = arith.index_cast %189 : i32 to index
    %c0_60 = arith.constant 0 : index
    %194 = vector.load %arg9[%193, %c0_60] : memref<64x256xf32, #tpu.memory_space<vmem>>, vector<8x128xf32>
    %c0_61 = arith.constant 0 : index
    %c0_62 = arith.constant 0 : index
    %195 = vector.load %arg3[%c0_61, %c0_62] : memref<32x128xf32, #tpu.memory_space<vmem>>, vector<32x128xf32>
    %cst_63 = arith.constant dense<0.000000e+00> : vector<8x128xf32>
    %196 = tpu.matmul %185, %195, %cst_63 {dimension_numbers = #tpu.dot_dimension_numbers<[1], [0], [0], [1], [0, 0, 1, 1], [], []>} : vector<8x32xf32>, vector<32x128xf32>, vector<8x128xf32> -> vector<8x128xf32>
    %197 = arith.addf %194, %196 : vector<8x128xf32>
    %198 = arith.index_cast %192 : i32 to index
    %c128_64 = arith.constant 128 : index
    %199 = vector.load %arg9[%198, %c128_64] : memref<64x256xf32, #tpu.memory_space<vmem>>, vector<8x128xf32>
    %c0_65 = arith.constant 0 : index
    %c0_66 = arith.constant 0 : index
    %200 = vector.load %arg4[%c0_65, %c0_66] : memref<32x128xf32, #tpu.memory_space<vmem>>, vector<32x128xf32>
    %cst_67 = arith.constant dense<0.000000e+00> : vector<8x128xf32>
    %201 = tpu.matmul %187, %200, %cst_67 {dimension_numbers = #tpu.dot_dimension_numbers<[1], [0], [0], [1], [0, 0, 1, 1], [], []>} : vector<8x32xf32>, vector<32x128xf32>, vector<8x128xf32> -> vector<8x128xf32>
    %202 = arith.addf %199, %201 : vector<8x128xf32>
    %203 = arith.negf %197 : vector<8x128xf32>
    %204 = math.exp %203 : vector<8x128xf32>
    %cst_68 = arith.constant 1.000000e+00 : f32
    %205 = vector.broadcast %cst_68 : f32 to vector<8x128xf32>
    %206 = arith.addf %205, %204 : vector<8x128xf32>
    %207 = arith.divf %205, %206 : vector<8x128xf32>
    %208 = math.tanh %197 : vector<8x128xf32>
    %209 = vector.extract_strided_slice %207 {offsets = [0, 0], sizes = [8, 32], strides = [1, 1]} : vector<8x128xf32> to vector<8x32xf32>
    %210 = vector.extract_strided_slice %207 {offsets = [0, 32], sizes = [8, 32], strides = [1, 1]} : vector<8x128xf32> to vector<8x32xf32>
    %211 = vector.extract_strided_slice %208 {offsets = [0, 64], sizes = [8, 32], strides = [1, 1]} : vector<8x128xf32> to vector<8x32xf32>
    %212 = vector.extract_strided_slice %207 {offsets = [0, 96], sizes = [8, 32], strides = [1, 1]} : vector<8x128xf32> to vector<8x32xf32>
    %213 = arith.negf %202 : vector<8x128xf32>
    %214 = math.exp %213 : vector<8x128xf32>
    %cst_69 = arith.constant 1.000000e+00 : f32
    %215 = vector.broadcast %cst_69 : f32 to vector<8x128xf32>
    %216 = arith.addf %215, %214 : vector<8x128xf32>
    %217 = arith.divf %215, %216 : vector<8x128xf32>
    %218 = math.tanh %202 : vector<8x128xf32>
    %219 = vector.extract_strided_slice %217 {offsets = [0, 0], sizes = [8, 32], strides = [1, 1]} : vector<8x128xf32> to vector<8x32xf32>
    %220 = vector.extract_strided_slice %217 {offsets = [0, 32], sizes = [8, 32], strides = [1, 1]} : vector<8x128xf32> to vector<8x32xf32>
    %221 = vector.extract_strided_slice %218 {offsets = [0, 64], sizes = [8, 32], strides = [1, 1]} : vector<8x128xf32> to vector<8x32xf32>
    %222 = vector.extract_strided_slice %217 {offsets = [0, 96], sizes = [8, 32], strides = [1, 1]} : vector<8x128xf32> to vector<8x32xf32>
    %223 = arith.mulf %210, %180 : vector<8x32xf32>
    %224 = arith.mulf %209, %211 : vector<8x32xf32>
    %225 = arith.addf %223, %224 : vector<8x32xf32>
    %226 = arith.mulf %220, %183 : vector<8x32xf32>
    %227 = arith.mulf %219, %221 : vector<8x32xf32>
    %228 = arith.addf %226, %227 : vector<8x32xf32>
    %229 = math.tanh %225 : vector<8x32xf32>
    %230 = arith.mulf %212, %229 : vector<8x32xf32>
    %231 = math.tanh %228 : vector<8x32xf32>
    %232 = arith.mulf %222, %231 : vector<8x32xf32>
    %c5_i32 = arith.constant 5 : i32
    %c8_i32_70 = arith.constant 8 : i32
    %233 = arith.muli %c5_i32, %c8_i32_70 : i32
    %234 = tpu.assume_multiple %233, 8 : i32
    %c7_i32_71 = arith.constant 7 : i32
    %235 = arith.subi %c7_i32_71, %c5_i32 : i32
    %c8_i32_72 = arith.constant 8 : i32
    %236 = arith.muli %235, %c8_i32_72 : i32
    %237 = tpu.assume_multiple %236, 8 : i32
    %238 = arith.index_cast %234 : i32 to index
    %c0_73 = arith.constant 0 : index
    %239 = vector.load %arg9[%238, %c0_73] : memref<64x256xf32, #tpu.memory_space<vmem>>, vector<8x128xf32>
    %c0_74 = arith.constant 0 : index
    %c0_75 = arith.constant 0 : index
    %240 = vector.load %arg3[%c0_74, %c0_75] : memref<32x128xf32, #tpu.memory_space<vmem>>, vector<32x128xf32>
    %cst_76 = arith.constant dense<0.000000e+00> : vector<8x128xf32>
    %241 = tpu.matmul %230, %240, %cst_76 {dimension_numbers = #tpu.dot_dimension_numbers<[1], [0], [0], [1], [0, 0, 1, 1], [], []>} : vector<8x32xf32>, vector<32x128xf32>, vector<8x128xf32> -> vector<8x128xf32>
    %242 = arith.addf %239, %241 : vector<8x128xf32>
    %243 = arith.index_cast %237 : i32 to index
    %c128_77 = arith.constant 128 : index
    %244 = vector.load %arg9[%243, %c128_77] : memref<64x256xf32, #tpu.memory_space<vmem>>, vector<8x128xf32>
    %c0_78 = arith.constant 0 : index
    %c0_79 = arith.constant 0 : index
    %245 = vector.load %arg4[%c0_78, %c0_79] : memref<32x128xf32, #tpu.memory_space<vmem>>, vector<32x128xf32>
    %cst_80 = arith.constant dense<0.000000e+00> : vector<8x128xf32>
    %246 = tpu.matmul %232, %245, %cst_80 {dimension_numbers = #tpu.dot_dimension_numbers<[1], [0], [0], [1], [0, 0, 1, 1], [], []>} : vector<8x32xf32>, vector<32x128xf32>, vector<8x128xf32> -> vector<8x128xf32>
    %247 = arith.addf %244, %246 : vector<8x128xf32>
    %248 = arith.negf %242 : vector<8x128xf32>
    %249 = math.exp %248 : vector<8x128xf32>
    %cst_81 = arith.constant 1.000000e+00 : f32
    %250 = vector.broadcast %cst_81 : f32 to vector<8x128xf32>
    %251 = arith.addf %250, %249 : vector<8x128xf32>
    %252 = arith.divf %250, %251 : vector<8x128xf32>
    %253 = math.tanh %242 : vector<8x128xf32>
    %254 = vector.extract_strided_slice %252 {offsets = [0, 0], sizes = [8, 32], strides = [1, 1]} : vector<8x128xf32> to vector<8x32xf32>
    %255 = vector.extract_strided_slice %252 {offsets = [0, 32], sizes = [8, 32], strides = [1, 1]} : vector<8x128xf32> to vector<8x32xf32>
    %256 = vector.extract_strided_slice %253 {offsets = [0, 64], sizes = [8, 32], strides = [1, 1]} : vector<8x128xf32> to vector<8x32xf32>
    %257 = vector.extract_strided_slice %252 {offsets = [0, 96], sizes = [8, 32], strides = [1, 1]} : vector<8x128xf32> to vector<8x32xf32>
    %258 = arith.negf %247 : vector<8x128xf32>
    %259 = math.exp %258 : vector<8x128xf32>
    %cst_82 = arith.constant 1.000000e+00 : f32
    %260 = vector.broadcast %cst_82 : f32 to vector<8x128xf32>
    %261 = arith.addf %260, %259 : vector<8x128xf32>
    %262 = arith.divf %260, %261 : vector<8x128xf32>
    %263 = math.tanh %247 : vector<8x128xf32>
    %264 = vector.extract_strided_slice %262 {offsets = [0, 0], sizes = [8, 32], strides = [1, 1]} : vector<8x128xf32> to vector<8x32xf32>
    %265 = vector.extract_strided_slice %262 {offsets = [0, 32], sizes = [8, 32], strides = [1, 1]} : vector<8x128xf32> to vector<8x32xf32>
    %266 = vector.extract_strided_slice %263 {offsets = [0, 64], sizes = [8, 32], strides = [1, 1]} : vector<8x128xf32> to vector<8x32xf32>
    %267 = vector.extract_strided_slice %262 {offsets = [0, 96], sizes = [8, 32], strides = [1, 1]} : vector<8x128xf32> to vector<8x32xf32>
    %268 = arith.mulf %255, %225 : vector<8x32xf32>
    %269 = arith.mulf %254, %256 : vector<8x32xf32>
    %270 = arith.addf %268, %269 : vector<8x32xf32>
    %271 = arith.mulf %265, %228 : vector<8x32xf32>
    %272 = arith.mulf %264, %266 : vector<8x32xf32>
    %273 = arith.addf %271, %272 : vector<8x32xf32>
    %274 = math.tanh %270 : vector<8x32xf32>
    %275 = arith.mulf %257, %274 : vector<8x32xf32>
    %276 = math.tanh %273 : vector<8x32xf32>
    %277 = arith.mulf %267, %276 : vector<8x32xf32>
    %c6_i32 = arith.constant 6 : i32
    %c8_i32_83 = arith.constant 8 : i32
    %278 = arith.muli %c6_i32, %c8_i32_83 : i32
    %279 = tpu.assume_multiple %278, 8 : i32
    %c7_i32_84 = arith.constant 7 : i32
    %280 = arith.subi %c7_i32_84, %c6_i32 : i32
    %c8_i32_85 = arith.constant 8 : i32
    %281 = arith.muli %280, %c8_i32_85 : i32
    %282 = tpu.assume_multiple %281, 8 : i32
    %283 = arith.index_cast %279 : i32 to index
    %c0_86 = arith.constant 0 : index
    %284 = vector.load %arg9[%283, %c0_86] : memref<64x256xf32, #tpu.memory_space<vmem>>, vector<8x128xf32>
    %c0_87 = arith.constant 0 : index
    %c0_88 = arith.constant 0 : index
    %285 = vector.load %arg3[%c0_87, %c0_88] : memref<32x128xf32, #tpu.memory_space<vmem>>, vector<32x128xf32>
    %cst_89 = arith.constant dense<0.000000e+00> : vector<8x128xf32>
    %286 = tpu.matmul %275, %285, %cst_89 {dimension_numbers = #tpu.dot_dimension_numbers<[1], [0], [0], [1], [0, 0, 1, 1], [], []>} : vector<8x32xf32>, vector<32x128xf32>, vector<8x128xf32> -> vector<8x128xf32>
    %287 = arith.addf %284, %286 : vector<8x128xf32>
    %288 = arith.index_cast %282 : i32 to index
    %c128_90 = arith.constant 128 : index
    %289 = vector.load %arg9[%288, %c128_90] : memref<64x256xf32, #tpu.memory_space<vmem>>, vector<8x128xf32>
    %c0_91 = arith.constant 0 : index
    %c0_92 = arith.constant 0 : index
    %290 = vector.load %arg4[%c0_91, %c0_92] : memref<32x128xf32, #tpu.memory_space<vmem>>, vector<32x128xf32>
    %cst_93 = arith.constant dense<0.000000e+00> : vector<8x128xf32>
    %291 = tpu.matmul %277, %290, %cst_93 {dimension_numbers = #tpu.dot_dimension_numbers<[1], [0], [0], [1], [0, 0, 1, 1], [], []>} : vector<8x32xf32>, vector<32x128xf32>, vector<8x128xf32> -> vector<8x128xf32>
    %292 = arith.addf %289, %291 : vector<8x128xf32>
    %293 = arith.negf %287 : vector<8x128xf32>
    %294 = math.exp %293 : vector<8x128xf32>
    %cst_94 = arith.constant 1.000000e+00 : f32
    %295 = vector.broadcast %cst_94 : f32 to vector<8x128xf32>
    %296 = arith.addf %295, %294 : vector<8x128xf32>
    %297 = arith.divf %295, %296 : vector<8x128xf32>
    %298 = math.tanh %287 : vector<8x128xf32>
    %299 = vector.extract_strided_slice %297 {offsets = [0, 0], sizes = [8, 32], strides = [1, 1]} : vector<8x128xf32> to vector<8x32xf32>
    %300 = vector.extract_strided_slice %297 {offsets = [0, 32], sizes = [8, 32], strides = [1, 1]} : vector<8x128xf32> to vector<8x32xf32>
    %301 = vector.extract_strided_slice %298 {offsets = [0, 64], sizes = [8, 32], strides = [1, 1]} : vector<8x128xf32> to vector<8x32xf32>
    %302 = vector.extract_strided_slice %297 {offsets = [0, 96], sizes = [8, 32], strides = [1, 1]} : vector<8x128xf32> to vector<8x32xf32>
    %303 = arith.negf %292 : vector<8x128xf32>
    %304 = math.exp %303 : vector<8x128xf32>
    %cst_95 = arith.constant 1.000000e+00 : f32
    %305 = vector.broadcast %cst_95 : f32 to vector<8x128xf32>
    %306 = arith.addf %305, %304 : vector<8x128xf32>
    %307 = arith.divf %305, %306 : vector<8x128xf32>
    %308 = math.tanh %292 : vector<8x128xf32>
    %309 = vector.extract_strided_slice %307 {offsets = [0, 0], sizes = [8, 32], strides = [1, 1]} : vector<8x128xf32> to vector<8x32xf32>
    %310 = vector.extract_strided_slice %307 {offsets = [0, 32], sizes = [8, 32], strides = [1, 1]} : vector<8x128xf32> to vector<8x32xf32>
    %311 = vector.extract_strided_slice %308 {offsets = [0, 64], sizes = [8, 32], strides = [1, 1]} : vector<8x128xf32> to vector<8x32xf32>
    %312 = vector.extract_strided_slice %307 {offsets = [0, 96], sizes = [8, 32], strides = [1, 1]} : vector<8x128xf32> to vector<8x32xf32>
    %313 = arith.mulf %300, %270 : vector<8x32xf32>
    %314 = arith.mulf %299, %301 : vector<8x32xf32>
    %315 = arith.addf %313, %314 : vector<8x32xf32>
    %316 = arith.mulf %310, %273 : vector<8x32xf32>
    %317 = arith.mulf %309, %311 : vector<8x32xf32>
    %318 = arith.addf %316, %317 : vector<8x32xf32>
    %319 = math.tanh %315 : vector<8x32xf32>
    %320 = arith.mulf %302, %319 : vector<8x32xf32>
    %321 = math.tanh %318 : vector<8x32xf32>
    %322 = arith.mulf %312, %321 : vector<8x32xf32>
    %c7_i32_96 = arith.constant 7 : i32
    %c8_i32_97 = arith.constant 8 : i32
    %323 = arith.muli %c7_i32_96, %c8_i32_97 : i32
    %324 = tpu.assume_multiple %323, 8 : i32
    %c7_i32_98 = arith.constant 7 : i32
    %325 = arith.subi %c7_i32_98, %c7_i32_96 : i32
    %c8_i32_99 = arith.constant 8 : i32
    %326 = arith.muli %325, %c8_i32_99 : i32
    %327 = tpu.assume_multiple %326, 8 : i32
    %328 = arith.index_cast %324 : i32 to index
    %c0_100 = arith.constant 0 : index
    %329 = vector.load %arg9[%328, %c0_100] : memref<64x256xf32, #tpu.memory_space<vmem>>, vector<8x128xf32>
    %c0_101 = arith.constant 0 : index
    %c0_102 = arith.constant 0 : index
    %330 = vector.load %arg3[%c0_101, %c0_102] : memref<32x128xf32, #tpu.memory_space<vmem>>, vector<32x128xf32>
    %cst_103 = arith.constant dense<0.000000e+00> : vector<8x128xf32>
    %331 = tpu.matmul %320, %330, %cst_103 {dimension_numbers = #tpu.dot_dimension_numbers<[1], [0], [0], [1], [0, 0, 1, 1], [], []>} : vector<8x32xf32>, vector<32x128xf32>, vector<8x128xf32> -> vector<8x128xf32>
    %332 = arith.addf %329, %331 : vector<8x128xf32>
    %333 = arith.index_cast %327 : i32 to index
    %c128_104 = arith.constant 128 : index
    %334 = vector.load %arg9[%333, %c128_104] : memref<64x256xf32, #tpu.memory_space<vmem>>, vector<8x128xf32>
    %c0_105 = arith.constant 0 : index
    %c0_106 = arith.constant 0 : index
    %335 = vector.load %arg4[%c0_105, %c0_106] : memref<32x128xf32, #tpu.memory_space<vmem>>, vector<32x128xf32>
    %cst_107 = arith.constant dense<0.000000e+00> : vector<8x128xf32>
    %336 = tpu.matmul %322, %335, %cst_107 {dimension_numbers = #tpu.dot_dimension_numbers<[1], [0], [0], [1], [0, 0, 1, 1], [], []>} : vector<8x32xf32>, vector<32x128xf32>, vector<8x128xf32> -> vector<8x128xf32>
    %337 = arith.addf %334, %336 : vector<8x128xf32>
    %338 = arith.negf %332 : vector<8x128xf32>
    %339 = math.exp %338 : vector<8x128xf32>
    %cst_108 = arith.constant 1.000000e+00 : f32
    %340 = vector.broadcast %cst_108 : f32 to vector<8x128xf32>
    %341 = arith.addf %340, %339 : vector<8x128xf32>
    %342 = arith.divf %340, %341 : vector<8x128xf32>
    %343 = math.tanh %332 : vector<8x128xf32>
    %344 = vector.extract_strided_slice %342 {offsets = [0, 0], sizes = [8, 32], strides = [1, 1]} : vector<8x128xf32> to vector<8x32xf32>
    %345 = vector.extract_strided_slice %342 {offsets = [0, 32], sizes = [8, 32], strides = [1, 1]} : vector<8x128xf32> to vector<8x32xf32>
    %346 = vector.extract_strided_slice %343 {offsets = [0, 64], sizes = [8, 32], strides = [1, 1]} : vector<8x128xf32> to vector<8x32xf32>
    %347 = vector.extract_strided_slice %342 {offsets = [0, 96], sizes = [8, 32], strides = [1, 1]} : vector<8x128xf32> to vector<8x32xf32>
    %348 = arith.negf %337 : vector<8x128xf32>
    %349 = math.exp %348 : vector<8x128xf32>
    %cst_109 = arith.constant 1.000000e+00 : f32
    %350 = vector.broadcast %cst_109 : f32 to vector<8x128xf32>
    %351 = arith.addf %350, %349 : vector<8x128xf32>
    %352 = arith.divf %350, %351 : vector<8x128xf32>
    %353 = math.tanh %337 : vector<8x128xf32>
    %354 = vector.extract_strided_slice %352 {offsets = [0, 0], sizes = [8, 32], strides = [1, 1]} : vector<8x128xf32> to vector<8x32xf32>
    %355 = vector.extract_strided_slice %352 {offsets = [0, 32], sizes = [8, 32], strides = [1, 1]} : vector<8x128xf32> to vector<8x32xf32>
    %356 = vector.extract_strided_slice %353 {offsets = [0, 64], sizes = [8, 32], strides = [1, 1]} : vector<8x128xf32> to vector<8x32xf32>
    %357 = vector.extract_strided_slice %352 {offsets = [0, 96], sizes = [8, 32], strides = [1, 1]} : vector<8x128xf32> to vector<8x32xf32>
    %358 = arith.mulf %345, %315 : vector<8x32xf32>
    %359 = arith.mulf %344, %346 : vector<8x32xf32>
    %360 = arith.addf %358, %359 : vector<8x32xf32>
    %361 = arith.mulf %355, %318 : vector<8x32xf32>
    %362 = arith.mulf %354, %356 : vector<8x32xf32>
    %363 = arith.addf %361, %362 : vector<8x32xf32>
    %364 = math.tanh %360 : vector<8x32xf32>
    %365 = arith.mulf %347, %364 : vector<8x32xf32>
    %366 = math.tanh %363 : vector<8x32xf32>
    %367 = arith.mulf %357, %366 : vector<8x32xf32>
    %c8_i32_110 = arith.constant 8 : i32
    %c0_111 = arith.constant 0 : index
    %c0_112 = arith.constant 0 : index
    %368 = vector.load %arg5[%c0_111, %c0_112] : memref<32x4xf32, #tpu.memory_space<vmem>>, vector<32x4xf32>
    %cst_113 = arith.constant dense<0.000000e+00> : vector<8x4xf32>
    %369 = tpu.matmul %365, %368, %cst_113 {dimension_numbers = #tpu.dot_dimension_numbers<[1], [0], [0], [1], [0, 0, 1, 1], [], []>} : vector<8x32xf32>, vector<32x4xf32>, vector<8x4xf32> -> vector<8x4xf32>
    %c0_114 = arith.constant 0 : index
    %c0_115 = arith.constant 0 : index
    %370 = vector.load %arg6[%c0_114, %c0_115] : memref<32x4xf32, #tpu.memory_space<vmem>>, vector<32x4xf32>
    %cst_116 = arith.constant dense<0.000000e+00> : vector<8x4xf32>
    %371 = tpu.matmul %367, %370, %cst_116 {dimension_numbers = #tpu.dot_dimension_numbers<[1], [0], [0], [1], [0, 0, 1, 1], [], []>} : vector<8x32xf32>, vector<32x4xf32>, vector<8x4xf32> -> vector<8x4xf32>
    %372 = arith.addf %369, %371 : vector<8x4xf32>
    %c0_117 = arith.constant 0 : index
    %c0_118 = arith.constant 0 : index
    %373 = vector.load %arg7[%c0_117, %c0_118] : memref<1x4xf32, #tpu.memory_space<vmem>>, vector<1x4xf32>
    %374 = vector.broadcast %373 : vector<1x4xf32> to vector<8x4xf32>
    %375 = arith.addf %372, %374 : vector<8x4xf32>
    %c0_119 = arith.constant 0 : index
    %c0_120 = arith.constant 0 : index
    %376 = vector.load %arg8[%c0_119, %c0_120] : memref<8x4xf32, #tpu.memory_space<vmem>>, vector<8x4xf32>
    tpu.vector_store %arg8[%c0_119, %c0_120], %375 {strides = array<i32>} : memref<8x4xf32, #tpu.memory_space<vmem>>, vector<8x4xf32>,
    return
  }
}

</mosaic_0001>

<bundles_post_ra>
// kernel: a_call__.1
= control target key start
LH: loop header
LB: loop body
LE: loop exit
PB: predicated region body
PF: predicated region fallthrough
CT: control target
= control target key end

     0   :  { %v2602_v0 = vmov 0.0|0.0   ;;  %v2603_v4 = vmov 0.0   ;;  %vm2604_vm0 = vmmov 0   ;;  %vm53_vm1 = vcmask 130048   ;;  %s2997_s1 = inlined_call_operand.vmem [shape: f32[16,256], index: 1, kind: input, shape index: {}]   ;;  %s2998_s3 = inlined_call_operand.vmem [shape: f32[32,128], index: 3, kind: input, shape index: {}]   ;;  %s2999_s0 = inlined_call_operand.vmem [shape: f32[64,16], index: 0, kind: input, shape index: {}]   ;;  %s3000_s4 = inlined_call_operand.vmem [shape: f32[32,128], index: 4, kind: input, shape index: {}]   ;;  %s3001_s2 = inlined_call_operand.vmem [shape: f32[1,256], index: 2, kind: input, shape index: {}]   ;;  %s3002_s5 = inlined_call_operand.vmem [shape: f32[32,4], index: 5, kind: input, shape index: {}]   ;;  %s3003_s6 = inlined_call_operand.vmem [shape: f32[32,4], index: 6, kind: input, shape index: {}]   ;;  %s3004_s7 = inlined_call_operand.vmem [shape: f32[1,4], index: 7, kind: input, shape index: {}]   ;;  %s3005_s8 = inlined_call_operand.vmem [shape: f32[8,4], index: 8, kind: output, shape index: {}]  }
   0x1   :  { %2361 = vmatprep.subr.bf16.mxu1 %v2602_v0  ;;  %v38_v1 = vld [vmem:[%s2997_s1 + $0x8] sm:$0xff]  ;;  %v40_v2 = vld [vmem:[%s2997_s1 + $0x18] sm:$0xff]  ;;  %v211_v3 = vld [vmem:[%s2998_s3] sm:$0xff]  ;;  %142 = vmatprep.mubr.f32.mxu0 %v2603_v4  ;;  %v43_v28 = vlaneseq  ;;  %vm215_vm2 = vcmask 261120   ;;  %vm2015_vm3 = vcmask 31744  }
   0x2   :  { %v2357_v5 = vpack.c.bf16 %v40_v2, %v38_v1  ;;  %v212_v6 = vld [vmem:[%s2998_s3 + $0x8] sm:$0xff]  ;;  %v37_v7 = vld [vmem:[%s2997_s1] sm:$0xff]  ;;  %v39_v8 = vld [vmem:[%s2997_s1 + $0x10] sm:$0xff]  ;;  %2167 = vmatprep.mubr.msk.f32.mxu1 %vm2604_vm0, %v2603_v4 }
   0x3   :  { %v2674_v9 = vpack.c.bf16 %v212_v6, %v211_v3  ;;  %v2359_v10 = vpack.c.bf16 %v39_v8, %v37_v7  ;;  %v213_v11 = vld [vmem:[%s2998_s3 + $0x10] sm:$0xff]  ;;  %v214_v12 = vld [vmem:[%s2998_s3 + $0x18] sm:$0xff]  ;;  %v29_v13 = vld [vmem:[%s2999_s0] sm:$0xff]  ;;  %v44_v29 = vshrl.u32 %v43_v28, 7 }
   0x4   :  { %2358 = vmatprep.subr.bf16.mxu0 %v2357_v5  ;;  %v2686_v14 = vpack.c.bf16 %v214_v12, %v213_v11  ;;  %v294_v15 = vld [vmem:[%s3000_s4] sm:$0xff]  ;;  %v295_v16 = vld [vmem:[%s3000_s4 + $0x8] sm:$0xff]  ;;  %v296_v19 = vld [vmem:[%s3000_s4 + $0x10] sm:$0xff] }
   0x5   :  { %2363 = vmatpush3.bf16.msra.mxu1 %v2674_v9  ;;  %2360 = vmatpush1.bf16.msra.mxu0 %v2359_v10  ;;  %v30_v17 = vld [vmem:[%s2999_s0 + $0x8] sm:$0xff]  ;;  %v2702_v18 = vpack.c.bf16 %v295_v16, %v294_v15  ;;  %v297_v20 = vld [vmem:[%s3000_s4 + $0x18] sm:$0xff]  ;;  %v31_v21 = vld [vmem:[%s2999_s0 + $0x10] sm:$0xff]  ;;  %v45_v30 = vsub.s32 0, %v44_v29  ;;  %v49_v32 = vsub.s32 1, %v44_v29 }
   0x6   :  { %2364 = vmatprep.subr.bf16.mxu1 %v2602_v0  ;;  %2385 = vmatprep.subr.bf16.mxu0 %v2602_v0  ;;  %v2720_v22 = vpack.c.bf16 %v297_v20, %v296_v19  ;;  %v32_v23 = vld [vmem:[%s2999_s0 + $0x18] sm:$0xff]  ;;  %v33_v24 = vld [vmem:[%s2999_s0 + $0x20] sm:$0xff]  ;;  %v34_v25 = vld [vmem:[%s2999_s0 + $0x28] sm:$0xff] }
   0x7   :  { %v35_v26 = vld [vmem:[%s2999_s0 + $0x30] sm:$0xff]  ;;  %v36_v27 = vld [vmem:[%s2999_s0 + $0x38] sm:$0xff]  ;;  %v41_v31 = vld [vmem:[%s3001_s2] sm:$0x3]  ;;  %s2605_s0 = smov 64   ;;  %s2606_s2 = smov 32  }
   0x8   :  { %2028 = vmatmul.mubr.msk.f32.vlgmr.msra.gmra.mrb[0].mxu0 %vm53_vm1, %v29_v13  ;;  %v46_v33 = vrot.slane %v41_v31, %v45_v30  ;;  %v50_v34 = vrot.slane %v41_v31, %v49_v32 }
   0x9   :  { %2366 = vmatpush3.bf16.msra.mxu1 %v2686_v14  ;;  %148 = vmatprep.mubr.f32.mxu0 %v2603_v4 }
   0xa   :  { %2367 = vmatprep.subr.bf16.mxu1 %v2602_v0  ;;  %2387 = vmatpush3.bf16.msra.mxu0 %v2674_v9 }
   0xb   :  { %2388 = vmatprep.subr.bf16.mxu0 %v2602_v0 }
   0xc   :  { %2168 = vmatmul.mubr.f32.vlgmr.msra.gmra.mrb[0].mxu1 %v2603_v4  ;;  %2029 = vmatmul.mubr.msk.f32.gmra.mrb[2].mxu0 %vm53_vm1, %v30_v17 }
   0xd   :  { %154 = vmatprep.mubr.f32.mxu0 %v2603_v4  ;;  %2369 = vmatpush3.bf16.msra.mxu1 %v2702_v18 }
   0xe   :  { %2370 = vmatprep.subr.bf16.mxu1 %v2602_v0  ;;  %2178 = vmatprep.mubr.msk.f32.mxu1 %vm2604_vm0, %v2603_v4 }
   0xf   :  { %2390 = vmatpush3.bf16.msra.mxu0 %v2686_v14 }
  0x10   :  { %2030 = vmatmul.mubr.msk.f32.gmra.mrb[4].mxu0 %vm53_vm1, %v31_v21  ;;  %2397 = vmatprep.subr.bf16.mxu0 %v2602_v0 }
  0x11   :  { %160 = vmatprep.mubr.f32.mxu0 %v2603_v4  ;;  %2372 = vmatpush3.bf16.msra.mxu1 %v2720_v22 }
  0x12   :  { %2373 = vmatprep.subr.bf16.mxu1 %v2602_v0 }
  0x14   :  { %2031 = vmatmul.mubr.msk.f32.gmra.mrb[6].mxu0 %vm53_vm1, %v32_v23  ;;  %2179 = vmatmul.mubr.f32.vlgmr.msra.gmra.mrb[2].mxu1 %v2603_v4 }
  0x15   :  { %166 = vmatprep.mubr.f32.mxu0 %v2603_v4  ;;  %2375 = vmatpush3.bf16.msra.mxu1 %v2674_v9 }
  0x16   :  { %2376 = vmatprep.subr.bf16.mxu1 %v2602_v0  ;;  %2189 = vmatprep.mubr.msk.f32.mxu1 %vm2604_vm0, %v2603_v4 }
  0x18   :  { %2032 = vmatmul.mubr.msk.f32.gmra.mrb[8].mxu0 %vm53_vm1, %v33_v24 }
  0x19   :  { %172 = vmatprep.mubr.f32.mxu0 %v2603_v4  ;;  %2378 = vmatpush3.bf16.msra.mxu1 %v2686_v14 }
  0x1a   :  { %2379 = vmatprep.subr.bf16.mxu1 %v2602_v0 }
  0x1c   :  { %2033 = vmatmul.mubr.msk.f32.gmra.mrb[10].mxu0 %vm53_vm1, %v34_v25 }
  0x1d   :  { %178 = vmatprep.mubr.f32.mxu0 %v2603_v4 }
  0x20   :  { %2034 = vmatmul.mubr.msk.f32.gmra.mrb[12].mxu0 %vm53_vm1, %v35_v26 }
  0x21   :  { %184 = vmatprep.mubr.f32.mxu0 %v2603_v4 }
  0x24   :  { %2035 = vmatmul.mubr.msk.f32.gmra.mrb[14].mxu0 %vm53_vm1, %v36_v27 }
  0x25   :  { %2211 = vmatprep.mubr.msk.f32.mxu0 %vm2604_vm0, %v2603_v4 }
  0xdb   :  { %v144_v35 = vpop.f32.mrb[0].mxu0 }
  0xdc   :  { %v145_v36 = vadd.f32 %v144_v35, %v46_v33  ;;  %v146_v37 = vpop.f32.mrb[1].mxu0 }
  0xdd   :  { %v2767_v38 = vadd.f32 %v146_v37, %v50_v34 }
  0xdf   :  { %v285_v39 = vpop.f32.mrb[0].mxu1  ;;  %v150_v40 = vpop.f32.mrb[2].mxu0 }
  0xe0   :  { %v289_v41 = vadd.f32 %v285_v39, %v145_v36  ;;  %v2769_v42 = vadd.f32 %v150_v40, %v46_v33  ;;  %v152_v43 = vpop.f32.mrb[3].mxu0  ;;  %v2169_v44 = vpop.f32.mrb[1].mxu1 }
  0xe1   :  { %v2771_v45 = vadd.f32 %v152_v43, %v50_v34 }
  0xe2   :  { %2474 = vtanh.f32 %v289_v41  ;;  %v2036_v15 = vmul.f32 -1.442695, %v289_v41 }
  0xe3   :  { %v156_v46 = vpop.f32.mrb[4].mxu0 }
  0xe4   :  { %v2773_v47 = vadd.f32 %v156_v46, %v46_v33  ;;  %v158_v48 = vpop.f32.mrb[5].mxu0 }
  0xe5   :  { %v2775_v49 = vadd.f32 %v158_v48, %v50_v34 }
  0xe7   :  { %v162_v50 = vpop.f32.mrb[6].mxu0  ;;  %v364_v51 = vpop.f32.mrb[2].mxu1 }
  0xe8   :  { %v2777_v52 = vadd.f32 %v162_v50, %v46_v33  ;;  %v164_v53 = vpop.f32.mrb[7].mxu0  ;;  %v2180_v54 = vpop.f32.mrb[3].mxu1 }
  0xe9   :  { %v2779_v55 = vadd.f32 %v164_v53, %v50_v34 }
  0xeb   :  { %v168_v56 = vpop.f32.mrb[8].mxu0 }
  0xec   :  { %v2475_v57 = vpop.eup %2474  ;;  %v2781_v58 = vadd.f32 %v168_v56, %v46_v33  ;;  %v170_v59 = vpop.f32.mrb[9].mxu0 }
  0xed   :  { %v2783_v60 = vadd.f32 %v170_v59, %v50_v34  ;;  %385 = vrot.lane.b32.xlu0 %v2475_v57, %s2605_s0 }
  0xef   :  { %v174_v61 = vpop.f32.mrb[10].mxu0 }
  0xf0   :  { %v2786_v62 = vadd.f32 %v174_v61, %v46_v33  ;;  %v176_v63 = vpop.f32.mrb[11].mxu0 }
  0xf1   :  { %v2788_v1 = vadd.f32 %v176_v63, %v50_v34 }
  0xf3   :  { %v180_v2 = vpop.f32.mrb[12].mxu0 }
  0xf4   :  { %v2790_v3 = vadd.f32 %v180_v2, %v46_v33  ;;  %v182_v5 = vpop.f32.mrb[13].mxu0 }
  0xf5   :  { %v2792_v6 = vadd.f32 %v182_v5, %v50_v34 }
  0xf7   :  { %v186_v7 = vpop.f32.mrb[14].mxu0 }
  0xf8   :  { %v2794_v8 = vadd.f32 %v186_v7, %v46_v33  ;;  %v188_v10 = vpop.f32.mrb[15].mxu0 }
  0xf9   :  { %v189_v11 = vadd.f32 %v188_v10, %v50_v34 }
  0xfb   :  { %v368_v12 = vadd.f32 %v364_v51, %v189_v11 }
  0xfd   :  { %2476 = vtanh.f32 %v368_v12  ;;  %v2037_v19 = vmul.f32 -1.442695, %v368_v12 }
  0xfe   :  { %2478 = vpow2.f32 %v2036_v15 }
 0x107   :  { %v2477_v13 = vpop.eup %2476 }
 0x108   :  { %396 = vrot.lane.b32.xlu0 %v2477_v13, %s2605_s0  ;;  %v2479_v16 = vpop.eup %2478 }
 0x109   :  { %v372_v17 = vadd.f32 1.0, %v2479_v16 }
 0x10b   :  { %2480 = vrcp.f32 %v372_v17 }
 0x10c   :  { %2482 = vpow2.f32 %v2037_v19 }
 0x115   :  { %v2481_v20 = vpop.eup %2480 }
 0x116   :  { %v2483_v24 = vpop.eup %2482  ;;  %v383_v29 = vmul.f32 0.0, %v2481_v20 }
 0x117   :  { %v379_v25 = vadd.f32 1.0, %v2483_v24 }
 0x119   :  { %2484 = vrcp.f32 %v379_v25 }
 0x123   :  { %v2485_v26 = vpop.eup %2484 }
 0x124   :  { %v394_v33 = vmul.f32 0.0, %v2485_v26 }
 0x15f   :  { %v386_v21 = vpop.permute.xlu0 %385 }
 0x160   :  { %v388_v23 = vmul.f32 %v2481_v20, %v386_v21 }
 0x162   :  { %390 = vrot.lane.b32.xlu1 %v388_v23, %s2606_s2 }
 0x17a   :  { %v397_v27 = vpop.permute.xlu0 %396 }
 0x17b   :  { %v399_v28 = vmul.f32 %v2485_v26, %v397_v27 }
 0x17d   :  { %401 = vrot.lane.b32.xlu1 %v399_v28, %s2606_s2 }
 0x1d4   :  { %v391_v30 = vpop.permute.xlu1 %390 }
 0x1d5   :  { %v393_v31 = vadd.f32 %v391_v30, %v383_v29 }
 0x1d7   :  { %2486 = vtanh.f32 %v393_v31 }
 0x1e1   :  { %v2487_v32 = vpop.eup %2486 }
 0x1e2   :  { %407 = vrot.lane.b32.xlu0 %v2487_v32, %s2605_s0 }
 0x1ef   :  { %v402_v34 = vpop.permute.xlu1 %401 }
 0x1f0   :  { %v404_v35 = vadd.f32 %v402_v34, %v394_v33 }
 0x1f2   :  { %2488 = vtanh.f32 %v404_v35 }
 0x1fc   :  { %v2489_v36 = vpop.eup %2488 }
 0x1fd   :  { %413 = vrot.lane.b32.xlu1 %v2489_v36, %s2605_s0 }
 0x254   :  { %v408_v37 = vpop.permute.xlu0 %407 }
 0x255   :  { %v410_v39 = vmul.f32 %v2481_v20, %v408_v37 }
 0x257   :  { %422 = vrot.lane.b32.xlu0 %v410_v39, %s2606_s2 }
 0x26f   :  { %v414_v40 = vpop.permute.xlu1 %413 }
 0x270   :  { %v416_v41 = vmul.f32 %v2485_v26, %v414_v40 }
 0x272   :  { %502 = vrot.lane.b32.xlu1 %v416_v41, %s2606_s2 }
 0x2c9   :  { %v423_v43 = vpop.permute.xlu0 %422 }
 0x2ca   :  { %2190 = vmatmul.mubr.msk.f32.vlgmr.msra.gmra.mrb[4].mxu1 %vm215_vm2, %v423_v43 }
 0x2cb   :  { %2381 = vmatpush3.bf16.msra.mxu1 %v2702_v18  ;;  %2200 = vmatprep.mubr.msk.f32.mxu1 %vm2604_vm0, %v2603_v4 }
 0x2cc   :  { %2382 = vmatprep.subr.bf16.mxu1 %v2602_v0 }
 0x2cf   :  { %2384 = vmatpush3.bf16.msra.mxu1 %v2720_v22 }
 0x2d0   :  { %2391 = vmatprep.subr.bf16.mxu1 %v2602_v0 }
 0x2e4   :  { %v503_v44 = vpop.permute.xlu1 %502 }
 0x2e5   :  { %2201 = vmatmul.mubr.msk.f32.vlgmr.msra.gmra.mrb[6].mxu1 %vm215_vm2, %v503_v44 }
 0x2e6   :  { %2393 = vmatpush3.bf16.msra.mxu1 %v2702_v18  ;;  %2222 = vmatprep.mubr.msk.f32.mxu1 %vm2604_vm0, %v2603_v4 }
 0x2e7   :  { %2394 = vmatprep.subr.bf16.mxu1 %v2602_v0 }
 0x2ea   :  { %2396 = vmatpush3.bf16.msra.mxu1 %v2720_v22 }
 0x2eb   :  { %2403 = vmatprep.subr.bf16.mxu1 %v2602_v0 }
 0x39d   :  { %v492_v46 = vpop.f32.mrb[4].mxu1 }
 0x39e   :  { %v496_v48 = vadd.f32 %v492_v46, %v2769_v42  ;;  %v2191_v50 = vpop.f32.mrb[5].mxu1 }
 0x3a0   :  { %2490 = vtanh.f32 %v496_v48  ;;  %v2040_v59 = vmul.f32 -1.442695, %v496_v48 }
 0x3aa   :  { %v2491_v51 = vpop.eup %2490 }
 0x3ab   :  { %593 = vrot.lane.b32.xlu0 %v2491_v51, %s2605_s0 }
 0x3b8   :  { %v572_v53 = vpop.f32.mrb[6].mxu1 }
 0x3b9   :  { %v576_v54 = vadd.f32 %v572_v53, %v2792_v6  ;;  %v2202_v56 = vpop.f32.mrb[7].mxu1 }
 0x3bb   :  { %2492 = vtanh.f32 %v576_v54  ;;  %v2041_v2 = vmul.f32 -1.442695, %v576_v54 }
 0x3bc   :  { %2494 = vpow2.f32 %v2040_v59 }
 0x3c5   :  { %v2493_v57 = vpop.eup %2492 }
 0x3c6   :  { %604 = vrot.lane.b32.xlu1 %v2493_v57, %s2605_s0  ;;  %v2495_v61 = vpop.eup %2494 }
 0x3c7   :  { %v580_v63 = vadd.f32 1.0, %v2495_v61 }
 0x3c9   :  { %2496 = vrcp.f32 %v580_v63 }
 0x3ca   :  { %2498 = vpow2.f32 %v2041_v2 }
 0x3d3   :  { %v2497_v42 = vpop.eup %2496 }
 0x3d4   :  { %v2499_v10 = vpop.eup %2498  ;;  %v591_v15 = vmul.f32 %v2497_v42, %v393_v31 }
 0x3d5   :  { %v587_v11 = vadd.f32 1.0, %v2499_v10 }
 0x3d7   :  { %2500 = vrcp.f32 %v587_v11 }
 0x3e1   :  { %v2501_v6 = vpop.eup %2500 }
 0x3e2   :  { %v602_v20 = vmul.f32 %v2501_v6, %v404_v35 }
 0x41d   :  { %v594_v5 = vpop.permute.xlu0 %593 }
 0x41e   :  { %v596_v7 = vmul.f32 %v2497_v42, %v594_v5 }
 0x420   :  { %598 = vrot.lane.b32.xlu0 %v596_v7, %s2606_s2 }
 0x438   :  { %v605_v12 = vpop.permute.xlu1 %604 }
 0x439   :  { %v607_v13 = vmul.f32 %v2501_v6, %v605_v12 }
 0x43b   :  { %609 = vrot.lane.b32.xlu1 %v607_v13, %s2606_s2 }
 0x492   :  { %v599_v16 = vpop.permute.xlu0 %598 }
 0x493   :  { %v601_v17 = vadd.f32 %v599_v16, %v591_v15 }
 0x495   :  { %2502 = vtanh.f32 %v601_v17 }
 0x49f   :  { %v2503_v19 = vpop.eup %2502 }
 0x4a0   :  { %615 = vrot.lane.b32.xlu0 %v2503_v19, %s2605_s0 }
 0x4ad   :  { %v610_v21 = vpop.permute.xlu1 %609 }
 0x4ae   :  { %v612_v23 = vadd.f32 %v610_v21, %v602_v20 }
 0x4b0   :  { %2504 = vtanh.f32 %v612_v23 }
 0x4ba   :  { %v2505_v24 = vpop.eup %2504 }
 0x4bb   :  { %621 = vrot.lane.b32.xlu1 %v2505_v24, %s2605_s0 }
 0x512   :  { %v616_v25 = vpop.permute.xlu0 %615 }
 0x513   :  { %v618_v26 = vmul.f32 %v2497_v42, %v616_v25 }
 0x515   :  { %630 = vrot.lane.b32.xlu0 %v618_v26, %s2606_s2 }
 0x52d   :  { %v622_v27 = vpop.permute.xlu1 %621 }
 0x52e   :  { %v624_v28 = vmul.f32 %v2501_v6, %v622_v27 }
 0x530   :  { %710 = vrot.lane.b32.xlu1 %v624_v28, %s2606_s2 }
 0x587   :  { %v631_v29 = vpop.permute.xlu0 %630 }
 0x588   :  { %2212 = vmatmul.mubr.msk.f32.vlgmr.msra.gmra.mrb[16].mxu0 %vm215_vm2, %v631_v29 }
 0x589   :  { %2399 = vmatpush3.bf16.msra.mxu0 %v2674_v9  ;;  %2233 = vmatprep.mubr.msk.f32.mxu0 %vm2604_vm0, %v2603_v4 }
 0x58a   :  { %2400 = vmatprep.subr.bf16.mxu0 %v2602_v0 }
 0x58d   :  { %2402 = vmatpush3.bf16.msra.mxu0 %v2686_v14 }
 0x58e   :  { %2409 = vmatprep.subr.bf16.mxu0 %v2602_v0 }
 0x5a2   :  { %v711_v30 = vpop.permute.xlu1 %710 }
 0x5a3   :  { %2223 = vmatmul.mubr.msk.f32.vlgmr.msra.gmra.mrb[8].mxu1 %vm215_vm2, %v711_v30 }
 0x5a4   :  { %2405 = vmatpush3.bf16.msra.mxu1 %v2702_v18  ;;  %2244 = vmatprep.mubr.msk.f32.mxu1 %vm2604_vm0, %v2603_v4 }
 0x5a5   :  { %2406 = vmatprep.subr.bf16.mxu1 %v2602_v0 }
 0x5a8   :  { %2408 = vmatpush3.bf16.msra.mxu1 %v2720_v22 }
 0x5a9   :  { %2415 = vmatprep.subr.bf16.mxu1 %v2602_v0 }
 0x65b   :  { %v700_v31 = vpop.f32.mrb[16].mxu0 }
 0x65c   :  { %v704_v32 = vadd.f32 %v700_v31, %v2773_v47  ;;  %v2213_v33 = vpop.f32.mrb[17].mxu0 }
 0x65e   :  { %2506 = vtanh.f32 %v704_v32  ;;  %v2044_v40 = vmul.f32 -1.442695, %v704_v32 }
 0x668   :  { %v2507_v34 = vpop.eup %2506 }
 0x669   :  { %801 = vrot.lane.b32.xlu0 %v2507_v34, %s2605_s0 }
 0x676   :  { %v780_v35 = vpop.f32.mrb[8].mxu1 }
 0x677   :  { %v784_v36 = vadd.f32 %v780_v35, %v2788_v1  ;;  %v2224_v37 = vpop.f32.mrb[9].mxu1 }
 0x679   :  { %2508 = vtanh.f32 %v784_v36  ;;  %v2045_v44 = vmul.f32 -1.442695, %v784_v36 }
 0x67a   :  { %2510 = vpow2.f32 %v2044_v40 }
 0x683   :  { %v2509_v39 = vpop.eup %2508 }
 0x684   :  { %812 = vrot.lane.b32.xlu1 %v2509_v39, %s2605_s0  ;;  %v2511_v41 = vpop.eup %2510 }
 0x685   :  { %v788_v43 = vadd.f32 1.0, %v2511_v41 }
 0x687   :  { %2512 = vrcp.f32 %v788_v43 }
 0x688   :  { %2514 = vpow2.f32 %v2045_v44 }
 0x691   :  { %v2513_v47 = vpop.eup %2512 }
 0x692   :  { %v2515_v50 = vpop.eup %2514  ;;  %v799_v56 = vmul.f32 %v2513_v47, %v601_v17 }
 0x693   :  { %v795_v51 = vadd.f32 1.0, %v2515_v50 }
 0x695   :  { %2516 = vrcp.f32 %v795_v51 }
 0x69f   :  { %v2517_v1 = vpop.eup %2516 }
 0x6a0   :  { %v810_v63 = vmul.f32 %v2517_v1, %v612_v23 }
 0x6db   :  { %v802_v46 = vpop.permute.xlu0 %801 }
 0x6dc   :  { %v804_v48 = vmul.f32 %v2513_v47, %v802_v46 }
 0x6de   :  { %806 = vrot.lane.b32.xlu0 %v804_v48, %s2606_s2 }
 0x6f6   :  { %v813_v53 = vpop.permute.xlu1 %812 }
 0x6f7   :  { %v815_v54 = vmul.f32 %v2517_v1, %v813_v53 }
 0x6f9   :  { %817 = vrot.lane.b32.xlu1 %v815_v54, %s2606_s2 }
 0x750   :  { %v807_v57 = vpop.permute.xlu0 %806 }
 0x751   :  { %v809_v59 = vadd.f32 %v807_v57, %v799_v56 }
 0x753   :  { %2518 = vtanh.f32 %v809_v59 }
 0x75d   :  { %v2519_v61 = vpop.eup %2518 }
 0x75e   :  { %823 = vrot.lane.b32.xlu0 %v2519_v61, %s2605_s0 }
 0x76b   :  { %v818_v2 = vpop.permute.xlu1 %817 }
 0x76c   :  { %v820_v42 = vadd.f32 %v818_v2, %v810_v63 }
 0x76e   :  { %2520 = vtanh.f32 %v820_v42 }
 0x778   :  { %v2521_v5 = vpop.eup %2520 }
 0x779   :  { %829 = vrot.lane.b32.xlu1 %v2521_v5, %s2605_s0 }
 0x7d0   :  { %v824_v7 = vpop.permute.xlu0 %823 }
 0x7d1   :  { %v826_v10 = vmul.f32 %v2513_v47, %v824_v7 }
 0x7d3   :  { %838 = vrot.lane.b32.xlu0 %v826_v10, %s2606_s2 }
 0x7eb   :  { %v830_v11 = vpop.permute.xlu1 %829 }
 0x7ec   :  { %v832_v6 = vmul.f32 %v2517_v1, %v830_v11 }
 0x7ee   :  { %918 = vrot.lane.b32.xlu1 %v832_v6, %s2606_s2 }
 0x845   :  { %v839_v12 = vpop.permute.xlu0 %838 }
 0x846   :  { %2234 = vmatmul.mubr.msk.f32.vlgmr.msra.gmra.mrb[18].mxu0 %vm215_vm2, %v839_v12 }
 0x847   :  { %2411 = vmatpush3.bf16.msra.mxu0 %v2674_v9  ;;  %2255 = vmatprep.mubr.msk.f32.mxu0 %vm2604_vm0, %v2603_v4 }
 0x848   :  { %2412 = vmatprep.subr.bf16.mxu0 %v2602_v0 }
 0x84b   :  { %2414 = vmatpush3.bf16.msra.mxu0 %v2686_v14 }
 0x84c   :  { %2421 = vmatprep.subr.bf16.mxu0 %v2602_v0 }
 0x860   :  { %v919_v13 = vpop.permute.xlu1 %918 }
 0x861   :  { %2245 = vmatmul.mubr.msk.f32.vlgmr.msra.gmra.mrb[10].mxu1 %vm215_vm2, %v919_v13 }
 0x862   :  { %2417 = vmatpush3.bf16.msra.mxu1 %v2702_v18  ;;  %2266 = vmatprep.mubr.msk.f32.mxu1 %vm2604_vm0, %v2603_v4 }
 0x863   :  { %2418 = vmatprep.subr.bf16.mxu1 %v2602_v0 }
 0x866   :  { %2420 = vmatpush3.bf16.msra.mxu1 %v2720_v22 }
 0x867   :  { %2427 = vmatprep.subr.bf16.mxu1 %v2602_v0 }
 0x919   :  { %v908_v15 = vpop.f32.mrb[18].mxu0 }
 0x91a   :  { %v912_v16 = vadd.f32 %v908_v15, %v2777_v52  ;;  %v2235_v17 = vpop.f32.mrb[19].mxu0 }
 0x91c   :  { %2522 = vtanh.f32 %v912_v16  ;;  %v2048_v25 = vmul.f32 -1.442695, %v912_v16 }
 0x926   :  { %v2523_v19 = vpop.eup %2522 }
 0x927   :  { %1009 = vrot.lane.b32.xlu0 %v2523_v19, %s2605_s0 }
 0x934   :  { %v988_v20 = vpop.f32.mrb[10].mxu1 }
 0x935   :  { %v992_v21 = vadd.f32 %v988_v20, %v2783_v60  ;;  %v2246_v23 = vpop.f32.mrb[11].mxu1 }
 0x937   :  { %2524 = vtanh.f32 %v992_v21  ;;  %v2049_v28 = vmul.f32 -1.442695, %v992_v21 }
 0x938   :  { %2526 = vpow2.f32 %v2048_v25 }
 0x941   :  { %v2525_v24 = vpop.eup %2524 }
 0x942   :  { %1020 = vrot.lane.b32.xlu1 %v2525_v24, %s2605_s0  ;;  %v2527_v26 = vpop.eup %2526 }
 0x943   :  { %v996_v27 = vadd.f32 1.0, %v2527_v26 }
 0x945   :  { %2528 = vrcp.f32 %v996_v27 }
 0x946   :  { %2530 = vpow2.f32 %v2049_v28 }
 0x94f   :  { %v2529_v52 = vpop.eup %2528 }
 0x950   :  { %v2531_v31 = vpop.eup %2530  ;;  %v1007_v35 = vmul.f32 %v2529_v52, %v809_v59 }
 0x951   :  { %v1003_v32 = vadd.f32 1.0, %v2531_v31 }
 0x953   :  { %2532 = vrcp.f32 %v1003_v32 }
 0x95d   :  { %v2533_v60 = vpop.eup %2532 }
 0x95e   :  { %v1018_v40 = vmul.f32 %v2533_v60, %v820_v42 }
 0x999   :  { %v1010_v29 = vpop.permute.xlu0 %1009 }
 0x99a   :  { %v1012_v30 = vmul.f32 %v2529_v52, %v1010_v29 }
 0x99c   :  { %1014 = vrot.lane.b32.xlu0 %v1012_v30, %s2606_s2 }
 0x9b4   :  { %v1021_v33 = vpop.permute.xlu1 %1020 }
 0x9b5   :  { %v1023_v34 = vmul.f32 %v2533_v60, %v1021_v33 }
 0x9b7   :  { %1025 = vrot.lane.b32.xlu1 %v1023_v34, %s2606_s2 }
 0xa0e   :  { %v1015_v36 = vpop.permute.xlu0 %1014 }
 0xa0f   :  { %v1017_v37 = vadd.f32 %v1015_v36, %v1007_v35 }
 0xa11   :  { %2534 = vtanh.f32 %v1017_v37 }
 0xa1b   :  { %v2535_v39 = vpop.eup %2534 }
 0xa1c   :  { %1031 = vrot.lane.b32.xlu0 %v2535_v39, %s2605_s0 }
 0xa29   :  { %v1026_v41 = vpop.permute.xlu1 %1025 }
 0xa2a   :  { %v1028_v43 = vadd.f32 %v1026_v41, %v1018_v40 }
 0xa2c   :  { %2536 = vtanh.f32 %v1028_v43 }
 0xa36   :  { %v2537_v44 = vpop.eup %2536 }
 0xa37   :  { %1037 = vrot.lane.b32.xlu1 %v2537_v44, %s2605_s0 }
 0xa8e   :  { %v1032_v47 = vpop.permute.xlu0 %1031 }
 0xa8f   :  { %v1034_v46 = vmul.f32 %v2529_v52, %v1032_v47 }
 0xa91   :  { %1043 = vrot.lane.b32.xlu0 %v1034_v46, %s2606_s2 }
 0xaa9   :  { %v1038_v48 = vpop.permute.xlu1 %1037 }
 0xaaa   :  { %v1040_v50 = vmul.f32 %v2533_v60, %v1038_v48 }
 0xaac   :  { %1120 = vrot.lane.b32.xlu1 %v1040_v50, %s2606_s2 }
 0xb03   :  { %v1044_v51 = vpop.permute.xlu0 %1043 }
 0xb04   :  { %2256 = vmatmul.mubr.msk.f32.vlgmr.msra.gmra.mrb[20].mxu0 %vm215_vm2, %v1044_v51 }
 0xb05   :  { %2423 = vmatpush3.bf16.msra.mxu0 %v2674_v9  ;;  %2277 = vmatprep.mubr.msk.f32.mxu0 %vm2604_vm0, %v2603_v4 }
 0xb06   :  { %2424 = vmatprep.subr.bf16.mxu0 %v2602_v0 }
 0xb09   :  { %2426 = vmatpush3.bf16.msra.mxu0 %v2686_v14 }
 0xb0a   :  { %2433 = vmatprep.subr.bf16.mxu0 %v2602_v0 }
 0xb1e   :  { %v1121_v1 = vpop.permute.xlu1 %1120 }
 0xb1f   :  { %2267 = vmatmul.mubr.msk.f32.vlgmr.msra.gmra.mrb[12].mxu1 %vm215_vm2, %v1121_v1 }
 0xb20   :  { %2429 = vmatpush3.bf16.msra.mxu1 %v2702_v18  ;;  %2288 = vmatprep.mubr.msk.f32.mxu1 %vm2604_vm0, %v2603_v4 }
 0xb21   :  { %2430 = vmatprep.subr.bf16.mxu1 %v2602_v0 }
 0xb24   :  { %2432 = vmatpush3.bf16.msra.mxu1 %v2720_v22 }
 0xb25   :  { %2439 = vmatprep.subr.bf16.mxu1 %v2602_v0 }
 0xbd7   :  { %v1113_v53 = vpop.f32.mrb[20].mxu0 }
 0xbd8   :  { %v1117_v54 = vadd.f32 %v1113_v53, %v2781_v58  ;;  %v2257_v56 = vpop.f32.mrb[21].mxu0 }
 0xbda   :  { %2538 = vtanh.f32 %v1117_v54  ;;  %v2052_v42 = vmul.f32 -1.442695, %v1117_v54 }
 0xbe4   :  { %v2539_v57 = vpop.eup %2538 }
 0xbe5   :  { %1211 = vrot.lane.b32.xlu0 %v2539_v57, %s2605_s0 }
 0xbf2   :  { %v1190_v59 = vpop.f32.mrb[12].mxu1 }
 0xbf3   :  { %v1194_v61 = vadd.f32 %v1190_v59, %v2779_v55  ;;  %v2268_v63 = vpop.f32.mrb[13].mxu1 }
 0xbf5   :  { %2540 = vtanh.f32 %v1194_v61  ;;  %v2053_v10 = vmul.f32 -1.442695, %v1194_v61 }
 0xbf6   :  { %2542 = vpow2.f32 %v2052_v42 }
 0xbff   :  { %v2541_v2 = vpop.eup %2540 }
 0xc00   :  { %1222 = vrot.lane.b32.xlu1 %v2541_v2, %s2605_s0  ;;  %v2543_v5 = vpop.eup %2542 }
 0xc01   :  { %v1198_v7 = vadd.f32 1.0, %v2543_v5 }
 0xc03   :  { %2544 = vrcp.f32 %v1198_v7 }
 0xc04   :  { %2546 = vpow2.f32 %v2053_v10 }
 0xc0d   :  { %v2545_v58 = vpop.eup %2544 }
 0xc0e   :  { %v2547_v12 = vpop.eup %2546  ;;  %v1209_v17 = vmul.f32 %v2545_v58, %v1017_v37 }
 0xc0f   :  { %v1205_v13 = vadd.f32 1.0, %v2547_v12 }
 0xc11   :  { %2548 = vrcp.f32 %v1205_v13 }
 0xc1b   :  { %v2549_v55 = vpop.eup %2548 }
 0xc1c   :  { %v1220_v23 = vmul.f32 %v2549_v55, %v1028_v43 }
 0xc57   :  { %v1212_v11 = vpop.permute.xlu0 %1211 }
 0xc58   :  { %v1214_v6 = vmul.f32 %v2545_v58, %v1212_v11 }
 0xc5a   :  { %1216 = vrot.lane.b32.xlu0 %v1214_v6, %s2606_s2 }
 0xc72   :  { %v1223_v15 = vpop.permute.xlu1 %1222 }
 0xc73   :  { %v1225_v16 = vmul.f32 %v2549_v55, %v1223_v15 }
 0xc75   :  { %1227 = vrot.lane.b32.xlu1 %v1225_v16, %s2606_s2 }
 0xccc   :  { %v1217_v19 = vpop.permute.xlu0 %1216 }
 0xccd   :  { %v1219_v20 = vadd.f32 %v1217_v19, %v1209_v17 }
 0xccf   :  { %2550 = vtanh.f32 %v1219_v20 }
 0xcd9   :  { %v2551_v21 = vpop.eup %2550 }
 0xcda   :  { %1233 = vrot.lane.b32.xlu0 %v2551_v21, %s2605_s0 }
 0xce7   :  { %v1228_v24 = vpop.permute.xlu1 %1227 }
 0xce8   :  { %v1230_v25 = vadd.f32 %v1228_v24, %v1220_v23 }
 0xcea   :  { %2552 = vtanh.f32 %v1230_v25 }
 0xcf4   :  { %v2553_v26 = vpop.eup %2552 }
 0xcf5   :  { %1239 = vrot.lane.b32.xlu1 %v2553_v26, %s2605_s0 }
 0xd4c   :  { %v1234_v27 = vpop.permute.xlu0 %1233 }
 0xd4d   :  { %v1236_v28 = vmul.f32 %v2545_v58, %v1234_v27 }
 0xd4f   :  { %1245 = vrot.lane.b32.xlu0 %v1236_v28, %s2606_s2 }
 0xd67   :  { %v1240_v52 = vpop.permute.xlu1 %1239 }
 0xd68   :  { %v1242_v29 = vmul.f32 %v2549_v55, %v1240_v52 }
 0xd6a   :  { %1322 = vrot.lane.b32.xlu1 %v1242_v29, %s2606_s2 }
 0xdc1   :  { %v1246_v30 = vpop.permute.xlu0 %1245 }
 0xdc2   :  { %2278 = vmatmul.mubr.msk.f32.vlgmr.msra.gmra.mrb[22].mxu0 %vm215_vm2, %v1246_v30 }
 0xdc3   :  { %2435 = vmatpush3.bf16.msra.mxu0 %v2674_v9  ;;  %2299 = vmatprep.mubr.msk.f32.mxu0 %vm2604_vm0, %v2603_v4 }
 0xdc4   :  { %2436 = vmatprep.subr.bf16.mxu0 %v2602_v0 }
 0xdc7   :  { %2438 = vmatpush3.bf16.msra.mxu0 %v2686_v14 }
 0xdc8   :  { %2445 = vmatprep.subr.bf16.mxu0 %v2602_v0 }
 0xddc   :  { %v1323_v31 = vpop.permute.xlu1 %1322 }
 0xddd   :  { %2289 = vmatmul.mubr.msk.f32.vlgmr.msra.gmra.mrb[14].mxu1 %vm215_vm2, %v1323_v31 }
 0xdde   :  { %2441 = vmatpush3.bf16.msra.mxu1 %v2702_v18  ;;  %2310 = vmatprep.mubr.msk.f32.mxu1 %vm2604_vm0, %v2603_v4 }
 0xddf   :  { %2442 = vmatprep.subr.bf16.mxu1 %v2602_v0 }
 0xde2   :  { %2444 = vmatpush3.bf16.msra.mxu1 %v2720_v22 }
 0xde3   :  { %2451 = vmatprep.subr.bf16.mxu1 %v2602_v0 }
 0xe95   :  { %v1315_v32 = vpop.f32.mrb[22].mxu0 }
 0xe96   :  { %v1319_v60 = vadd.f32 %v1315_v32, %v2786_v62  ;;  %v2279_v33 = vpop.f32.mrb[23].mxu0 }
 0xe98   :  { %2554 = vtanh.f32 %v1319_v60  ;;  %v2056_v40 = vmul.f32 -1.442695, %v1319_v60 }
 0xea2   :  { %v2555_v34 = vpop.eup %2554 }
 0xea3   :  { %1413 = vrot.lane.b32.xlu0 %v2555_v34, %s2605_s0 }
 0xeb0   :  { %v1392_v35 = vpop.f32.mrb[14].mxu1 }
 0xeb1   :  { %v1396_v36 = vadd.f32 %v1392_v35, %v2775_v49  ;;  %v2290_v37 = vpop.f32.mrb[15].mxu1 }
 0xeb3   :  { %2556 = vtanh.f32 %v1396_v36  ;;  %v2057_v44 = vmul.f32 -1.442695, %v1396_v36 }
 0xeb4   :  { %2558 = vpow2.f32 %v2056_v40 }
 0xebd   :  { %v2557_v39 = vpop.eup %2556 }
 0xebe   :  { %1424 = vrot.lane.b32.xlu1 %v2557_v39, %s2605_s0  ;;  %v2559_v41 = vpop.eup %2558 }
 0xebf   :  { %v1400_v43 = vadd.f32 1.0, %v2559_v41 }
 0xec1   :  { %2560 = vrcp.f32 %v1400_v43 }
 0xec2   :  { %2562 = vpow2.f32 %v2057_v44 }
 0xecb   :  { %v2561_v62 = vpop.eup %2560 }
 0xecc   :  { %v2563_v48 = vpop.eup %2562  ;;  %v1411_v53 = vmul.f32 %v2561_v62, %v1219_v20 }
 0xecd   :  { %v1407_v50 = vadd.f32 1.0, %v2563_v48 }
 0xecf   :  { %2564 = vrcp.f32 %v1407_v50 }
 0xed9   :  { %v2565_v49 = vpop.eup %2564 }
 0xeda   :  { %v1422_v59 = vmul.f32 %v2565_v49, %v1230_v25 }
 0xf15   :  { %v1414_v47 = vpop.permute.xlu0 %1413 }
 0xf16   :  { %v1416_v46 = vmul.f32 %v2561_v62, %v1414_v47 }
 0xf18   :  { %1418 = vrot.lane.b32.xlu0 %v1416_v46, %s2606_s2 }
 0xf30   :  { %v1425_v51 = vpop.permute.xlu1 %1424 }
 0xf31   :  { %v1427_v1 = vmul.f32 %v2565_v49, %v1425_v51 }
 0xf33   :  { %1429 = vrot.lane.b32.xlu1 %v1427_v1, %s2606_s2 }
 0xf8a   :  { %v1419_v54 = vpop.permute.xlu0 %1418 }
 0xf8b   :  { %v1421_v56 = vadd.f32 %v1419_v54, %v1411_v53 }
 0xf8d   :  { %2566 = vtanh.f32 %v1421_v56 }
 0xf97   :  { %v2567_v57 = vpop.eup %2566 }
 0xf98   :  { %1435 = vrot.lane.b32.xlu0 %v2567_v57, %s2605_s0 }
 0xfa5   :  { %v1430_v61 = vpop.permute.xlu1 %1429 }
 0xfa6   :  { %v1432_v63 = vadd.f32 %v1430_v61, %v1422_v59 }
 0xfa8   :  { %2568 = vtanh.f32 %v1432_v63 }
 0xfb2   :  { %v2569_v2 = vpop.eup %2568 }
 0xfb3   :  { %1441 = vrot.lane.b32.xlu1 %v2569_v2, %s2605_s0 }
0x100a   :  { %v1436_v42 = vpop.permute.xlu0 %1435 }
0x100b   :  { %v1438_v5 = vmul.f32 %v2561_v62, %v1436_v42 }
0x100d   :  { %1447 = vrot.lane.b32.xlu0 %v1438_v5, %s2606_s2 }
0x1025   :  { %v1442_v7 = vpop.permute.xlu1 %1441 }
0x1026   :  { %v1444_v10 = vmul.f32 %v2565_v49, %v1442_v7 }
0x1028   :  { %1524 = vrot.lane.b32.xlu1 %v1444_v10, %s2606_s2 }
0x107f   :  { %v1448_v58 = vpop.permute.xlu0 %1447 }
0x1080   :  { %2300 = vmatmul.mubr.msk.f32.vlgmr.msra.gmra.mrb[24].mxu0 %vm215_vm2, %v1448_v58  ;;  %v1849_v58 = vld [vmem:[%s3002_s5] sm:$0xff] }
0x1081   :  { %2447 = vmatpush3.bf16.msra.mxu0 %v2674_v9  ;;  %2321 = vmatprep.mubr.msk.f32.mxu0 %vm2604_vm0, %v2603_v4 }
0x1082   :  { %2448 = vmatprep.subr.bf16.mxu0 %v2602_v0 }
0x1085   :  { %2450 = vmatpush3.bf16.msra.mxu0 %v2686_v14 }
0x1086   :  { %2457 = vmatprep.subr.bf16.mxu0 %v2602_v0 }
0x109a   :  { %v1525_v11 = vpop.permute.xlu1 %1524 }
0x109b   :  { %2311 = vmatmul.mubr.msk.f32.vlgmr.msra.gmra.mrb[16].mxu1 %vm215_vm2, %v1525_v11  ;;  %v1850_v11 = vld [vmem:[%s3002_s5 + $0x8] sm:$0xff] }
0x109c   :  { %2453 = vmatpush3.bf16.msra.mxu1 %v2702_v18  ;;  %2332 = vmatprep.mubr.msk.f32.mxu1 %vm2604_vm0, %v2603_v4 }
0x109d   :  { %2454 = vmatprep.subr.bf16.mxu1 %v2602_v0 }
0x10a0   :  { %2456 = vmatpush3.bf16.msra.mxu1 %v2720_v22 }
0x10a1   :  { %2463 = vmatprep.subr.bf16.mxu1 %v2602_v0 }
0x1153   :  { %v1517_v9 = vpop.f32.mrb[24].mxu0 }
0x1154   :  { %v1521_v6 = vadd.f32 %v1517_v9, %v2790_v3  ;;  %v2301_v14 = vpop.f32.mrb[25].mxu0  ;;  %v1851_v9 = vld [vmem:[%s3002_s5 + $0x10] sm:$0xff] }
0x1155   :  { %v1852_v14 = vld [vmem:[%s3002_s5 + $0x18] sm:$0xff] }
0x1156   :  { %2570 = vtanh.f32 %v1521_v6  ;;  %v2060_v16 = vmul.f32 -1.442695, %v1521_v6  ;;  %v2464_v6 = vpack.c.bf16 %v1850_v11, %v1849_v58 }
0x1160   :  { %v2571_v12 = vpop.eup %2570 }
0x1161   :  { %1615 = vrot.lane.b32.xlu0 %v2571_v12, %s2605_s0  ;;  %v2467_v12 = vpack.c.bf16 %v1852_v14, %v1851_v9 }
0x116e   :  { %v1594_v13 = vpop.f32.mrb[16].mxu1 }
0x116f   :  { %v1598_v18 = vadd.f32 %v1594_v13, %v2771_v45  ;;  %v2312_v55 = vpop.f32.mrb[17].mxu1 }
0x1170   :  { %v1854_v55 = vld [vmem:[%s3003_s6 + $0x8] sm:$0xff] }
0x1171   :  { %2572 = vtanh.f32 %v1598_v18  ;;  %v2061_v19 = vmul.f32 -1.442695, %v1598_v18  ;;  %v1853_v18 = vld [vmem:[%s3003_s6] sm:$0xff] }
0x1172   :  { %2574 = vpow2.f32 %v2060_v16  ;;  %v2458_v16 = vpack.c.bf16 %v1854_v55, %v1853_v18 }
0x117b   :  { %v2573_v15 = vpop.eup %2572 }
0x117c   :  { %1626 = vrot.lane.b32.xlu1 %v2573_v15, %s2605_s0  ;;  %v2575_v22 = vpop.eup %2574  ;;  %v1855_v15 = vld [vmem:[%s3003_s6 + $0x10] sm:$0xff] }
0x117d   :  { %v1602_v17 = vadd.f32 1.0, %v2575_v22  ;;  %v1856_v22 = vld [vmem:[%s3003_s6 + $0x18] sm:$0xff] }
0x117f   :  { %2576 = vrcp.f32 %v1602_v17  ;;  %v2461_v17 = vpack.c.bf16 %v1856_v22, %v1855_v15 }
0x1180   :  { %2578 = vpow2.f32 %v2061_v19 }
0x1189   :  { %v2577_v3 = vpop.eup %2576 }
0x118a   :  { %v2579_v23 = vpop.eup %2578  ;;  %v1613_v27 = vmul.f32 %v2577_v3, %v1421_v56 }
0x118b   :  { %v1609_v24 = vadd.f32 1.0, %v2579_v23 }
0x118d   :  { %2580 = vrcp.f32 %v1609_v24 }
0x1197   :  { %v2581_v45 = vpop.eup %2580 }
0x1198   :  { %v1624_v30 = vmul.f32 %v2581_v45, %v1432_v63 }
0x11d3   :  { %v1616_v20 = vpop.permute.xlu0 %1615 }
0x11d4   :  { %v1618_v21 = vmul.f32 %v2577_v3, %v1616_v20 }
0x11d6   :  { %1620 = vrot.lane.b32.xlu0 %v1618_v21, %s2606_s2 }
0x11ee   :  { %v1627_v25 = vpop.permute.xlu1 %1626 }
0x11ef   :  { %v1629_v26 = vmul.f32 %v2581_v45, %v1627_v25 }
0x11f1   :  { %1631 = vrot.lane.b32.xlu1 %v1629_v26, %s2606_s2 }
0x1248   :  { %v1621_v28 = vpop.permute.xlu0 %1620 }
0x1249   :  { %v1623_v52 = vadd.f32 %v1621_v28, %v1613_v27 }
0x124b   :  { %2582 = vtanh.f32 %v1623_v52 }
0x1255   :  { %v2583_v29 = vpop.eup %2582 }
0x1256   :  { %1637 = vrot.lane.b32.xlu0 %v2583_v29, %s2605_s0 }
0x1263   :  { %v1632_v31 = vpop.permute.xlu1 %1631 }
0x1264   :  { %v1634_v32 = vadd.f32 %v1632_v31, %v1624_v30 }
0x1266   :  { %2584 = vtanh.f32 %v1634_v32 }
0x1270   :  { %v2585_v60 = vpop.eup %2584 }
0x1271   :  { %1643 = vrot.lane.b32.xlu1 %v2585_v60, %s2605_s0 }
0x12c8   :  { %v1638_v33 = vpop.permute.xlu0 %1637 }
0x12c9   :  { %v1640_v34 = vmul.f32 %v2577_v3, %v1638_v33 }
0x12cb   :  { %1649 = vrot.lane.b32.xlu0 %v1640_v34, %s2606_s2 }
0x12e3   :  { %v1644_v35 = vpop.permute.xlu1 %1643 }
0x12e4   :  { %v1646_v36 = vmul.f32 %v2581_v45, %v1644_v35 }
0x12e6   :  { %1726 = vrot.lane.b32.xlu1 %v1646_v36, %s2606_s2 }
0x133d   :  { %v1650_v37 = vpop.permute.xlu0 %1649 }
0x133e   :  { %2322 = vmatmul.mubr.msk.f32.vlgmr.msra.gmra.mrb[26].mxu0 %vm215_vm2, %v1650_v37 }
0x133f   :  { %2343 = vmatprep.mubr.msk.f32.mxu0 %vm2604_vm0, %v2603_v4  ;;  %2459 = vmatpush3.bf16.msra.mxu0 %v2458_v16 }
0x1340   :  { %2460 = vmatprep.subr.bf16.mxu0 %v2602_v0 }
0x1343   :  { %2462 = vmatpush3.bf16.msra.mxu0 %v2461_v17 }
0x1358   :  { %v1727_v39 = vpop.permute.xlu1 %1726 }
0x1359   :  { %2333 = vmatmul.mubr.msk.f32.vlgmr.msra.gmra.mrb[18].mxu1 %vm215_vm2, %v1727_v39 }
0x135a   :  { %2354 = vmatprep.mubr.msk.f32.mxu1 %vm2604_vm0, %v2603_v4  ;;  %2465 = vmatpush3.bf16.msra.mxu1 %v2464_v6 }
0x135b   :  { %2466 = vmatprep.subr.bf16.mxu1 %v2602_v0  ;;  %v2068_v0 = vld [vmem:[%s3004_s7] ss:$0 sm:$0xff] }
0x135e   :  { %2468 = vmatpush3.bf16.msra.mxu1 %v2467_v12 }
0x1411   :  { %v1719_v40 = vpop.f32.mrb[26].mxu0 }
0x1412   :  { %v1723_v41 = vadd.f32 %v1719_v40, %v2794_v8  ;;  %v2323_v43 = vpop.f32.mrb[27].mxu0 }
0x1414   :  { %2586 = vtanh.f32 %v1723_v41  ;;  %v2064_v50 = vmul.f32 -1.442695, %v1723_v41 }
0x141e   :  { %v2587_v44 = vpop.eup %2586 }
0x141f   :  { %1817 = vrot.lane.b32.xlu0 %v2587_v44, %s2605_s0 }
0x142c   :  { %v1796_v62 = vpop.f32.mrb[18].mxu1 }
0x142d   :  { %v1800_v47 = vadd.f32 %v1796_v62, %v2767_v38  ;;  %v2334_v46 = vpop.f32.mrb[19].mxu1 }
0x142f   :  { %2588 = vtanh.f32 %v1800_v47  ;;  %v2065_v51 = vmul.f32 -1.442695, %v1800_v47 }
0x1430   :  { %2590 = vpow2.f32 %v2064_v50 }
0x1439   :  { %v2589_v48 = vpop.eup %2588 }
0x143a   :  { %1828 = vrot.lane.b32.xlu1 %v2589_v48, %s2605_s0  ;;  %v2591_v49 = vpop.eup %2590 }
0x143b   :  { %v1804_v4 = vadd.f32 1.0, %v2591_v49 }
0x143d   :  { %2592 = vrcp.f32 %v1804_v4 }
0x143e   :  { %2594 = vpow2.f32 %v2065_v51 }
0x1447   :  { %v2593_v8 = vpop.eup %2592 }
0x1448   :  { %v2595_v54 = vpop.eup %2594  ;;  %v1815_v61 = vmul.f32 %v2593_v8, %v1623_v52 }
0x1449   :  { %v1811_v56 = vadd.f32 1.0, %v2595_v54 }
0x144b   :  { %2596 = vrcp.f32 %v1811_v56 }
0x1455   :  { %v2597_v38 = vpop.eup %2596 }
0x1456   :  { %v1826_v5 = vmul.f32 %v2597_v38, %v1634_v32 }
0x1491   :  { %v1818_v1 = vpop.permute.xlu0 %1817 }
0x1492   :  { %v1820_v53 = vmul.f32 %v2593_v8, %v1818_v1 }
0x1494   :  { %1822 = vrot.lane.b32.xlu0 %v1820_v53, %s2606_s2 }
0x14ac   :  { %v1829_v57 = vpop.permute.xlu1 %1828 }
0x14ad   :  { %v1831_v59 = vmul.f32 %v2597_v38, %v1829_v57 }
0x14af   :  { %1833 = vrot.lane.b32.xlu1 %v1831_v59, %s2606_s2 }
0x1506   :  { %v1823_v63 = vpop.permute.xlu0 %1822 }
0x1507   :  { %v1825_v2 = vadd.f32 %v1823_v63, %v1815_v61 }
0x1509   :  { %2598 = vtanh.f32 %v1825_v2 }
0x1513   :  { %v2599_v42 = vpop.eup %2598 }
0x1514   :  { %1839 = vrot.lane.b32.xlu0 %v2599_v42, %s2605_s0 }
0x1521   :  { %v1834_v7 = vpop.permute.xlu1 %1833 }
0x1522   :  { %v1836_v10 = vadd.f32 %v1834_v7, %v1826_v5 }
0x1524   :  { %2600 = vtanh.f32 %v1836_v10 }
0x152e   :  { %v2601_v13 = vpop.eup %2600 }
0x152f   :  { %1845 = vrot.lane.b32.xlu1 %v2601_v13, %s2605_s0 }
0x1586   :  { %v1840_v19 = vpop.permute.xlu0 %1839 }
0x1587   :  { %v1842_v3 = vmul.f32 %v2593_v8, %v1840_v19 }
0x1589   :  { %1933 = vrot.lane.b32.xlu1 %v1842_v3, %s2606_s2 }
0x15a1   :  { %v1846_v20 = vpop.permute.xlu1 %1845 }
0x15a2   :  { %v1848_v21 = vmul.f32 %v2597_v38, %v1846_v20 }
0x15a4   :  { %1858 = vrot.lane.b32.xlu0 %v1848_v21, %s2606_s2 }
0x15fb   :  { %v1934_v23 = vpop.permute.xlu1 %1933 }
0x15fc   :  { %2355 = vmatmul.mubr.msk.f32.vlgmr.msra.gmra.mrb[20].mxu1 %vm215_vm2, %v1934_v23 }
0x1616   :  { %v1859_v24 = vpop.permute.xlu0 %1858 }
0x1617   :  { %2344 = vmatmul.mubr.msk.f32.vlgmr.msra.gmra.mrb[28].mxu0 %vm215_vm2, %v1859_v24 }
0x16cf   :  { %v2003_v45 = vpop.f32.mrb[20].mxu1 }
0x16d0   :  { %v2356_v25 = vpop.f32.mrb[21].mxu1 }
0x16ea   :  { %v1928_v26 = vpop.f32.mrb[28].mxu0 }
0x16eb   :  { %v2004_v27 = vadd.f32 %v2003_v45, %v1928_v26  ;;  %v2345_v28 = vpop.f32.mrb[29].mxu0 }
0x16ed   :  { %v2014_v52 = vadd.f32 %v2068_v0, %v2004_v27 }
0x16ef   :  { %2016 = vst.msk [vmem:[%s3005_s8] sm:$0xff] %vm2015_vm3, %v2014_v52 }

</bundles_post_ra>
